<compile_context>
chip_gen: v7x
topology: tpu7x:2x2x1
jax: 0.10.0
libtpu: 0.0.40
codegen_flags: <defaults>
</compile_context>

<pallas_src>
import functools

import jax
import jax.numpy as jnp
from jax.experimental import pallas as pl
from jax.experimental.pallas import tpu as pltpu


def _round_up(x, m):
    return (x + m - 1) // m * m


# ---------------------------------------------------------------------------
# Kernel
# ---------------------------------------------------------------------------
def decoder_kernel(x_ref, w_ref, b_ref, out_ref, *, param_dim, block_rows):
    bf16 = jnp.bfloat16
    f32 = jnp.float32
    R = block_rows                      # rows per weight block (== slab width)

    def mm(x, blk):
        # [TB, R] bf16 @ [R, R] bf16 -> f32 accumulation on the MXU.
        return jnp.dot(x, w_ref[blk * R:(blk + 1) * R, :],
                       preferred_element_type=f32)

    def bias(row):
        return b_ref[row:row + 1, :]    # [1, R] f32, broadcasts over TB

    def lrelu(x):
        return jnp.where(x > 0, x, 0.2 * x)

    x = x_ref[...]                      # bf16 [TB, R] = [z | y | 0]

    # ---- hy = y_fc_layers(y) ----  (block 0 has yw1 at rows latent:latent+signal)
    hy = lrelu(mm(x, 0) + bias(0)).astype(bf16)
    hy = lrelu(mm(hy, 1) + bias(1)).astype(bf16)
    hy = lrelu(mm(hy, 2) + bias(2)).astype(bf16)

    # ---- hzy = fc_layers(concat([z, hy])) ----
    # concat([z, hy]) @ W1 == x @ W1z_padded + hy @ W1h   (zero-padded rows)
    h = lrelu(mm(x, 3) + mm(hy, 4) + bias(3)).astype(bf16)
    h = lrelu(mm(h, 5) + bias(4)).astype(bf16)
    h = lrelu(mm(h, 6) + bias(5)).astype(bf16)

    # ---- fused heads: cols [0:P) = loc, [P:2P) = log_var, rest zero padding ----
    v = mm(h, 7) + bias(6)              # f32 [TB, R]
    if param_dim > 1:
        col = jax.lax.broadcasted_iota(jnp.int32, v.shape, 1)
        is_sig = (col >= 1) & (col < param_dim)     # sigmoid on loc cols 1..P-1
        v = jnp.where(is_sig, jax.nn.sigmoid(v), v)
    out_ref[...] = v


# ---------------------------------------------------------------------------
# Host-side parameter packing (lane-dense bf16 weight slab + f32 bias slab)
# ---------------------------------------------------------------------------
def pack_decoder_params(params, *, latent_dim, hidden_dim, param_dim, signal_dim,
                        compute_dtype=jnp.bfloat16):
    (yw1, yb1, yw2, yb2, yw3, yb3,
     w1, b1, w2, b2, w3, b3,
     wloc, bloc, wlv, blv) = params

    H = hidden_dim
    P2 = 2 * param_dim
    S = _round_up(max(H, P2, latent_dim + signal_dim), 128)   # slab width & rows/block

    def block(entries):
        blk = jnp.zeros((S, S), jnp.float32)
        for row_off, w in entries:
            r, c = w.shape
            blk = blk.at[row_off:row_off + r, :c].set(w)
        return blk

    w_heads = jnp.concatenate([wloc, wlv], axis=1)            # [H, 2P]
    blocks = [
        block([(latent_dim, yw1)]),         # 0: y fc1 (consumes packed [z|y|0])
        block([(0, yw2)]),                  # 1: y fc2
        block([(0, yw3)]),                  # 2: y fc3
        block([(0, w1[:latent_dim])]),      # 3: fc1, z part (consumes packed slab)
        block([(0, w1[latent_dim:])]),      # 4: fc1, hy part
        block([(0, w2)]),                   # 5: fc2
        block([(0, w3)]),                   # 6: fc3
        block([(0, w_heads)]),              # 7: fused heads [loc | log_var]
    ]
    w_slab = jnp.concatenate(blocks, axis=0).astype(compute_dtype)   # [8S, S]

    b_heads = jnp.concatenate([jnp.ravel(bloc), jnp.ravel(blv)])
    bias_list = [yb1, yb2, yb3, b1, b2, b3, b_heads]
    rows = []
    for b in bias_list:
        b = jnp.ravel(b)[None, :]
        rows.append(jnp.pad(b, ((0, 0), (0, S - b.shape[1]))))
    n_pad = _round_up(len(rows), 8) - len(rows)
    if n_pad:
        rows.append(jnp.zeros((n_pad, S), jnp.float32))
    b_slab = jnp.concatenate(rows, axis=0).astype(jnp.float32)       # [8, S]

    return w_slab, b_slab


# ---------------------------------------------------------------------------
# Forward wrapper
# ---------------------------------------------------------------------------
def decoder_forward(z, y, w_slab, b_slab, *,
                    latent_dim, hidden_dim, param_dim, signal_dim, block_b=None):
    B = z.shape[0]
    S = w_slab.shape[1]                               # lane-dense slab width
    block_rows = w_slab.shape[0] // 8

    # merged lane-dense bf16 input slab  [Bp, S] = [z | y | 0]
    x = jnp.concatenate([z, y], axis=1)
    x = jnp.pad(x, ((0, 0), (0, S - x.shape[1]))).astype(jnp.bfloat16)

    B8 = _round_up(B, 8)
    if block_b is None:
        tb = B8 if B8 <= 512 else 512                 # whole batch in one step if small
    else:
        tb = _round_up(min(block_b, B8), 8)
    Bp = _round_up(B, tb)
    if Bp != B:
        x = jnp.pad(x, ((0, Bp - B), (0, 0)))

    kernel = functools.partial(decoder_kernel, param_dim=param_dim,
                               block_rows=block_rows)

    out = pl.pallas_call(
        kernel,
        out_shape=jax.ShapeDtypeStruct((Bp, S), jnp.float32),
        grid=(Bp // tb,),
        in_specs=[
            pl.BlockSpec((tb, S), lambda i: (i, 0)),            # input: batch-tiled
            pl.BlockSpec(w_slab.shape, lambda i: (0, 0)),       # weights: resident
            pl.BlockSpec(b_slab.shape, lambda i: (0, 0)),       # biases: resident
        ],
        out_specs=pl.BlockSpec((tb, S), lambda i: (i, 0)),      # lane-dense output
        compiler_params=pltpu.CompilerParams(
            dimension_semantics=("parallel",)),
    )(x, w_slab, b_slab)

    x_hat = out[:B, :param_dim]
    log_var = out[:B, param_dim:2 * param_dim]
    return x_hat, log_var


# ---------------------------------------------------------------------------
# Parameter init (matches PyTorch nn.Linear default), stored as [in, out]
# ---------------------------------------------------------------------------
def init_linear(key, fan_in, fan_out):
    kw, kb = jax.random.split(key)
    bound = 1.0 / jnp.sqrt(fan_in)
    w = jax.random.uniform(kw, (fan_in, fan_out), jnp.float32, -bound, bound)
    b = jax.random.uniform(kb, (1, fan_out), jnp.float32, -bound, bound)
    return w, b


if __name__ == "__main__":
    batch = 256
    latent_dim = 8
    hidden_dim = 32
    param_dim = 4
    signal_dim = 16

    key = jax.random.PRNGKey(0)
    keys = jax.random.split(key, 10)

    yw1, yb1 = init_linear(keys[0], signal_dim, hidden_dim)
    yw2, yb2 = init_linear(keys[1], hidden_dim, hidden_dim)
    yw3, yb3 = init_linear(keys[2], hidden_dim, hidden_dim)
    w1, b1 = init_linear(keys[3], latent_dim + hidden_dim, hidden_dim)
    w2, b2 = init_linear(keys[4], hidden_dim, hidden_dim)
    w3, b3 = init_linear(keys[5], hidden_dim, hidden_dim)
    wloc, bloc = init_linear(keys[6], hidden_dim, param_dim)
    wlv, blv = init_linear(keys[7], hidden_dim, param_dim)

    z = jax.random.normal(keys[8], (batch, latent_dim), jnp.float32)
    y = jax.random.normal(keys[9], (batch, signal_dim), jnp.float32)

    params = (yw1, yb1, yw2, yb2, yw3, yb3,
              w1, b1, w2, b2, w3, b3,
              wloc, bloc, wlv, blv)

    w_slab, b_slab = pack_decoder_params(
        params, latent_dim=latent_dim, hidden_dim=hidden_dim,
        param_dim=param_dim, signal_dim=signal_dim)

    x_hat, log_var = decoder_forward(
        z, y, w_slab, b_slab,
        latent_dim=latent_dim, hidden_dim=hidden_dim,
        param_dim=param_dim, signal_dim=signal_dim)
    jax.block_until_ready((x_hat, log_var))

    # ---- pure-JAX reference (mirrors bf16 operands / f32 accumulation) ----
    bf16 = jnp.bfloat16

    def lin(x, w, b):
        return jnp.dot(x.astype(bf16), w.astype(bf16),
                       preferred_element_type=jnp.float32) + b

    def lrelu(x):
        return jnp.where(x > 0, x, 0.2 * x)

    hy = lrelu(lin(y, yw1, yb1))
    hy = lrelu(lin(hy, yw2, yb2))
    hy = lrelu(lin(hy, yw3, yb3))
    zhy = jnp.concatenate([z, hy], axis=1)
    h = lrelu(lin(zhy, w1, b1))
    h = lrelu(lin(h, w2, b2))
    h = lrelu(lin(h, w3, b3))
    xh_ref = lin(h, wloc, bloc)
    lv_ref = lin(h, wlv, blv)
    xh_ref = jnp.concatenate([xh_ref[:, :1], jax.nn.sigmoid(xh_ref[:, 1:])], axis=1)

    assert jnp.allclose(x_hat, xh_ref, atol=2e-3, rtol=2e-3), "x_hat mismatch"
    assert jnp.allclose(log_var, lv_ref, atol=2e-3, rtol=2e-3), "log_var mismatch"

    print("KERNEL_OK")
</pallas_src>

<mosaic_0001>
module attributes {stable_mosaic.version = 11 : i64} {
  func.func @decoder_kernel(%arg0: i32, %arg1: memref<256x128xbf16, #tpu.memory_space<vmem>>, %arg2: memref<1024x128xbf16, #tpu.memory_space<vmem>>, %arg3: memref<8x128xf32, #tpu.memory_space<vmem>>, %arg4: memref<256x128xf32, #tpu.memory_space<vmem>>) attributes {dimension_semantics = [#tpu.dimension_semantics<parallel>], iteration_bounds = array<i64: 1>, scalar_prefetch = 0 : i64, scratch_operands = 0 : i64, tpu.core_type = #tpu.core_type<tc>, window_params = [{transform_indices = @transform_0, window_bounds = array<i64: 256, 128>}, {pipeline_mode = #tpu.pipeline_mode<synchronous>, transform_indices = @transform_1, window_bounds = array<i64: 1024, 128>}, {pipeline_mode = #tpu.pipeline_mode<synchronous>, transform_indices = @transform_2, window_bounds = array<i64: 8, 128>}, {transform_indices = @transform_3, window_bounds = array<i64: 256, 128>}]} {
    %c0 = arith.constant 0 : index
    %c0_0 = arith.constant 0 : index
    %0 = vector.load %arg1[%c0, %c0_0] : memref<256x128xbf16, #tpu.memory_space<vmem>>, vector<256x128xbf16>
    %c0_1 = arith.constant 0 : index
    %c0_2 = arith.constant 0 : index
    %1 = vector.load %arg2[%c0_1, %c0_2] : memref<1024x128xbf16, #tpu.memory_space<vmem>>, vector<128x128xbf16>
    %cst = arith.constant dense<0.000000e+00> : vector<256x128xf32>
    %2 = tpu.matmul %0, %1, %cst {dimension_numbers = #tpu.dot_dimension_numbers<[1], [0], [0], [1], [0, 0, 1, 1], [], []>} : vector<256x128xbf16>, vector<128x128xbf16>, vector<256x128xf32> -> vector<256x128xf32>
    %c0_3 = arith.constant 0 : index
    %c0_4 = arith.constant 0 : index
    %3 = vector.load %arg3[%c0_3, %c0_4] : memref<8x128xf32, #tpu.memory_space<vmem>>, vector<1x128xf32>
    %4 = vector.broadcast %3 : vector<1x128xf32> to vector<256x128xf32>
    %5 = arith.addf %2, %4 : vector<256x128xf32>
    %cst_5 = arith.constant 0.000000e+00 : f32
    %6 = vector.broadcast %cst_5 : f32 to vector<256x128xf32>
    %7 = arith.cmpf ogt, %5, %6 : vector<256x128xf32>
    %cst_6 = arith.constant 2.000000e-01 : f32
    %8 = vector.broadcast %cst_6 : f32 to vector<256x128xf32>
    %9 = arith.mulf %8, %5 : vector<256x128xf32>
    %10 = arith.select %7, %5, %9 : vector<256x128xi1>, vector<256x128xf32>
    %11 = arith.truncf %10 : vector<256x128xf32> to vector<256x128xbf16>
    %c128 = arith.constant 128 : index
    %c0_7 = arith.constant 0 : index
    %12 = vector.load %arg2[%c128, %c0_7] : memref<1024x128xbf16, #tpu.memory_space<vmem>>, vector<128x128xbf16>
    %cst_8 = arith.constant dense<0.000000e+00> : vector<256x128xf32>
    %13 = tpu.matmul %11, %12, %cst_8 {dimension_numbers = #tpu.dot_dimension_numbers<[1], [0], [0], [1], [0, 0, 1, 1], [], []>} : vector<256x128xbf16>, vector<128x128xbf16>, vector<256x128xf32> -> vector<256x128xf32>
    %c1 = arith.constant 1 : index
    %c0_9 = arith.constant 0 : index
    %14 = vector.load %arg3[%c1, %c0_9] : memref<8x128xf32, #tpu.memory_space<vmem>>, vector<1x128xf32>
    %15 = vector.broadcast %14 : vector<1x128xf32> to vector<256x128xf32>
    %16 = arith.addf %13, %15 : vector<256x128xf32>
    %cst_10 = arith.constant 0.000000e+00 : f32
    %17 = vector.broadcast %cst_10 : f32 to vector<256x128xf32>
    %18 = arith.cmpf ogt, %16, %17 : vector<256x128xf32>
    %cst_11 = arith.constant 2.000000e-01 : f32
    %19 = vector.broadcast %cst_11 : f32 to vector<256x128xf32>
    %20 = arith.mulf %19, %16 : vector<256x128xf32>
    %21 = arith.select %18, %16, %20 : vector<256x128xi1>, vector<256x128xf32>
    %22 = arith.truncf %21 : vector<256x128xf32> to vector<256x128xbf16>
    %c256 = arith.constant 256 : index
    %c0_12 = arith.constant 0 : index
    %23 = vector.load %arg2[%c256, %c0_12] : memref<1024x128xbf16, #tpu.memory_space<vmem>>, vector<128x128xbf16>
    %cst_13 = arith.constant dense<0.000000e+00> : vector<256x128xf32>
    %24 = tpu.matmul %22, %23, %cst_13 {dimension_numbers = #tpu.dot_dimension_numbers<[1], [0], [0], [1], [0, 0, 1, 1], [], []>} : vector<256x128xbf16>, vector<128x128xbf16>, vector<256x128xf32> -> vector<256x128xf32>
    %c2 = arith.constant 2 : index
    %c0_14 = arith.constant 0 : index
    %25 = vector.load %arg3[%c2, %c0_14] : memref<8x128xf32, #tpu.memory_space<vmem>>, vector<1x128xf32>
    %26 = vector.broadcast %25 : vector<1x128xf32> to vector<256x128xf32>
    %27 = arith.addf %24, %26 : vector<256x128xf32>
    %cst_15 = arith.constant 0.000000e+00 : f32
    %28 = vector.broadcast %cst_15 : f32 to vector<256x128xf32>
    %29 = arith.cmpf ogt, %27, %28 : vector<256x128xf32>
    %cst_16 = arith.constant 2.000000e-01 : f32
    %30 = vector.broadcast %cst_16 : f32 to vector<256x128xf32>
    %31 = arith.mulf %30, %27 : vector<256x128xf32>
    %32 = arith.select %29, %27, %31 : vector<256x128xi1>, vector<256x128xf32>
    %33 = arith.truncf %32 : vector<256x128xf32> to vector<256x128xbf16>
    %c384 = arith.constant 384 : index
    %c0_17 = arith.constant 0 : index
    %34 = vector.load %arg2[%c384, %c0_17] : memref<1024x128xbf16, #tpu.memory_space<vmem>>, vector<128x128xbf16>
    %cst_18 = arith.constant dense<0.000000e+00> : vector<256x128xf32>
    %35 = tpu.matmul %0, %34, %cst_18 {dimension_numbers = #tpu.dot_dimension_numbers<[1], [0], [0], [1], [0, 0, 1, 1], [], []>} : vector<256x128xbf16>, vector<128x128xbf16>, vector<256x128xf32> -> vector<256x128xf32>
    %c512 = arith.constant 512 : index
    %c0_19 = arith.constant 0 : index
    %36 = vector.load %arg2[%c512, %c0_19] : memref<1024x128xbf16, #tpu.memory_space<vmem>>, vector<128x128xbf16>
    %cst_20 = arith.constant dense<0.000000e+00> : vector<256x128xf32>
    %37 = tpu.matmul %33, %36, %cst_20 {dimension_numbers = #tpu.dot_dimension_numbers<[1], [0], [0], [1], [0, 0, 1, 1], [], []>} : vector<256x128xbf16>, vector<128x128xbf16>, vector<256x128xf32> -> vector<256x128xf32>
    %38 = arith.addf %35, %37 : vector<256x128xf32>
    %c3 = arith.constant 3 : index
    %c0_21 = arith.constant 0 : index
    %39 = vector.load %arg3[%c3, %c0_21] : memref<8x128xf32, #tpu.memory_space<vmem>>, vector<1x128xf32>
    %40 = vector.broadcast %39 : vector<1x128xf32> to vector<256x128xf32>
    %41 = arith.addf %38, %40 : vector<256x128xf32>
    %cst_22 = arith.constant 0.000000e+00 : f32
    %42 = vector.broadcast %cst_22 : f32 to vector<256x128xf32>
    %43 = arith.cmpf ogt, %41, %42 : vector<256x128xf32>
    %cst_23 = arith.constant 2.000000e-01 : f32
    %44 = vector.broadcast %cst_23 : f32 to vector<256x128xf32>
    %45 = arith.mulf %44, %41 : vector<256x128xf32>
    %46 = arith.select %43, %41, %45 : vector<256x128xi1>, vector<256x128xf32>
    %47 = arith.truncf %46 : vector<256x128xf32> to vector<256x128xbf16>
    %c640 = arith.constant 640 : index
    %c0_24 = arith.constant 0 : index
    %48 = vector.load %arg2[%c640, %c0_24] : memref<1024x128xbf16, #tpu.memory_space<vmem>>, vector<128x128xbf16>
    %cst_25 = arith.constant dense<0.000000e+00> : vector<256x128xf32>
    %49 = tpu.matmul %47, %48, %cst_25 {dimension_numbers = #tpu.dot_dimension_numbers<[1], [0], [0], [1], [0, 0, 1, 1], [], []>} : vector<256x128xbf16>, vector<128x128xbf16>, vector<256x128xf32> -> vector<256x128xf32>
    %c4 = arith.constant 4 : index
    %c0_26 = arith.constant 0 : index
    %50 = vector.load %arg3[%c4, %c0_26] : memref<8x128xf32, #tpu.memory_space<vmem>>, vector<1x128xf32>
    %51 = vector.broadcast %50 : vector<1x128xf32> to vector<256x128xf32>
    %52 = arith.addf %49, %51 : vector<256x128xf32>
    %cst_27 = arith.constant 0.000000e+00 : f32
    %53 = vector.broadcast %cst_27 : f32 to vector<256x128xf32>
    %54 = arith.cmpf ogt, %52, %53 : vector<256x128xf32>
    %cst_28 = arith.constant 2.000000e-01 : f32
    %55 = vector.broadcast %cst_28 : f32 to vector<256x128xf32>
    %56 = arith.mulf %55, %52 : vector<256x128xf32>
    %57 = arith.select %54, %52, %56 : vector<256x128xi1>, vector<256x128xf32>
    %58 = arith.truncf %57 : vector<256x128xf32> to vector<256x128xbf16>
    %c768 = arith.constant 768 : index
    %c0_29 = arith.constant 0 : index
    %59 = vector.load %arg2[%c768, %c0_29] : memref<1024x128xbf16, #tpu.memory_space<vmem>>, vector<128x128xbf16>
    %cst_30 = arith.constant dense<0.000000e+00> : vector<256x128xf32>
    %60 = tpu.matmul %58, %59, %cst_30 {dimension_numbers = #tpu.dot_dimension_numbers<[1], [0], [0], [1], [0, 0, 1, 1], [], []>} : vector<256x128xbf16>, vector<128x128xbf16>, vector<256x128xf32> -> vector<256x128xf32>
    %c5 = arith.constant 5 : index
    %c0_31 = arith.constant 0 : index
    %61 = vector.load %arg3[%c5, %c0_31] : memref<8x128xf32, #tpu.memory_space<vmem>>, vector<1x128xf32>
    %62 = vector.broadcast %61 : vector<1x128xf32> to vector<256x128xf32>
    %63 = arith.addf %60, %62 : vector<256x128xf32>
    %cst_32 = arith.constant 0.000000e+00 : f32
    %64 = vector.broadcast %cst_32 : f32 to vector<256x128xf32>
    %65 = arith.cmpf ogt, %63, %64 : vector<256x128xf32>
    %cst_33 = arith.constant 2.000000e-01 : f32
    %66 = vector.broadcast %cst_33 : f32 to vector<256x128xf32>
    %67 = arith.mulf %66, %63 : vector<256x128xf32>
    %68 = arith.select %65, %63, %67 : vector<256x128xi1>, vector<256x128xf32>
    %69 = arith.truncf %68 : vector<256x128xf32> to vector<256x128xbf16>
    %c896 = arith.constant 896 : index
    %c0_34 = arith.constant 0 : index
    %70 = vector.load %arg2[%c896, %c0_34] : memref<1024x128xbf16, #tpu.memory_space<vmem>>, vector<128x128xbf16>
    %cst_35 = arith.constant dense<0.000000e+00> : vector<256x128xf32>
    %71 = tpu.matmul %69, %70, %cst_35 {dimension_numbers = #tpu.dot_dimension_numbers<[1], [0], [0], [1], [0, 0, 1, 1], [], []>} : vector<256x128xbf16>, vector<128x128xbf16>, vector<256x128xf32> -> vector<256x128xf32>
    %c6 = arith.constant 6 : index
    %c0_36 = arith.constant 0 : index
    %72 = vector.load %arg3[%c6, %c0_36] : memref<8x128xf32, #tpu.memory_space<vmem>>, vector<1x128xf32>
    %73 = vector.broadcast %72 : vector<1x128xf32> to vector<256x128xf32>
    %74 = arith.addf %71, %73 : vector<256x128xf32>
    %75 = tpu.iota {dimensions = array<i32: 1>} : vector<256x128xi32>
    %c1_i32 = arith.constant 1 : i32
    %76 = vector.broadcast %c1_i32 : i32 to vector<256x128xi32>
    %77 = arith.cmpi sge, %75, %76 : vector<256x128xi32>
    %c4_i32 = arith.constant 4 : i32
    %78 = vector.broadcast %c4_i32 : i32 to vector<256x128xi32>
    %79 = arith.cmpi slt, %75, %78 : vector<256x128xi32>
    %80 = arith.andi %77, %79 : vector<256x128xi1>
    %81 = arith.negf %74 : vector<256x128xf32>
    %82 = math.exp %81 : vector<256x128xf32>
    %cst_37 = arith.constant 1.000000e+00 : f32
    %83 = vector.broadcast %cst_37 : f32 to vector<256x128xf32>
    %84 = arith.addf %83, %82 : vector<256x128xf32>
    %85 = arith.divf %83, %84 : vector<256x128xf32>
    %86 = arith.select %80, %85, %74 : vector<256x128xi1>, vector<256x128xf32>
    %c0_38 = arith.constant 0 : index
    %c0_39 = arith.constant 0 : index
    %87 = vector.load %arg4[%c0_38, %c0_39] : memref<256x128xf32, #tpu.memory_space<vmem>>, vector<256x128xf32>
    tpu.vector_store %arg4[%c0_38, %c0_39], %86 {strides = array<i32>} : memref<256x128xf32, #tpu.memory_space<vmem>>, vector<256x128xf32>,
    return
  }
  func.func @transform_0(%arg0: i32) -> (i32, i32) {
    %c0_i32 = arith.constant 0 : i32
    %c0_i32_0 = arith.constant 0 : i32
    return %arg0, %c0_i32 : i32, i32
  }
  func.func @transform_1(%arg0: i32) -> (i32, i32) {
    %c0_i32 = arith.constant 0 : i32
    %c0_i32_0 = arith.constant 0 : i32
    %c0_i32_1 = arith.constant 0 : i32
    return %c0_i32, %c0_i32_0 : i32, i32
  }
  func.func @transform_2(%arg0: i32) -> (i32, i32) {
    %c0_i32 = arith.constant 0 : i32
    %c0_i32_0 = arith.constant 0 : i32
    %c0_i32_1 = arith.constant 0 : i32
    return %c0_i32, %c0_i32_0 : i32, i32
  }
  func.func @transform_3(%arg0: i32) -> (i32, i32) {
    %c0_i32 = arith.constant 0 : i32
    %c0_i32_0 = arith.constant 0 : i32
    return %arg0, %c0_i32 : i32, i32
  }
}

</mosaic_0001>

<bundles_post_ra>
// kernel: tpu_custom_call.1
= control target key start
LH: loop header
LB: loop body
LE: loop exit
PB: predicated region body
PF: predicated region fallthrough
CT: control target
= control target key end

     0   :  { %8 = vsyncpa [#allocation3], 0  ;;  %s4571_s0 = inlined_call_operand.hbm [shape: bf16[256,128], index: 0, kind: input, shape index: {}]   ;;  %s4572_s1 = inlined_call_operand.hbm [shape: bf16[1024,128], index: 1, kind: input, shape index: {}]   ;;  %s4573_s2 = inlined_call_operand.hbm [shape: f32[8,128], index: 2, kind: input, shape index: {}]   ;;  %s4574_s3 = inlined_call_operand.hbm [shape: f32[256,128], index: 3, kind: output, shape index: {}]  }
   0x1   :  { %9 = vsyncpa [#allocation6], 0 }
   0x2   :  { %10 = vsyncpa [#allocation4], 0  ;;  %s4054_s12 = smov [#allocation5]   ;;  %s4055_s14 = smov [#allocation2]  }
   0x3   :  { %s28_s13 = sshll.u32 %s4054_s12, 4  ;;  %s16_s15 = sshll.u32 %s4055_s14, 4  ;;  %s29_s13 = int_to_ptr.vmem [resolvable:$true] %s28_s13  ;;  %s4082_s15 = int_to_ptr.vmem [resolvable:$true] %s16_s15 }
   0x4   :  { %s3960_s18 = scalar_lea.hbm %s4572_s1, 8192 }
   0x5   :  { %p3961_p0 = scmp.ne.s32.totalorder %s4572_s1, %s3960_s18  ;;  %p3964_p1 = scmp.lt.u32.totalorder %s3960_s18, %s4572_s1 }
   0x7   :  { %p3966_p2 = pnand %p3964_p1, %p3961_p0 }
   0x9   :  { %3969 = shalt.err (!%p3966_p2)
}
   0xa   :  { %s3970_s23 = scalar_lea.vmem %s29_s13, 8192  ;;  %p3975_p4 = scmp.lt.s32.totalorder %s29_s13, %s29_s13 }
   0xb   :  { %p3971_p3 = scmp.ne.s32.totalorder %s29_s13, %s3970_s23  ;;  %p3976_p5 = scmp.lt.s32.totalorder %s3970_s23, %s3970_s23 }
   0xd   :  { %p3977_p6 = por %p3976_p5, %p3975_p4 }
   0xf   :  { %p3978_p7 = pnand %p3977_p6, %p3971_p3 }
  0x11   :  { %3981 = shalt.err (!%p3978_p7)
}
  0x12   :  { %s4056_s24 = smov 64   ;;  %s4057_s25 = smov 4  }
  0x13   :  { %34 = dma.hbm_to_vmem [thread:$0]  %s4572_s1, 8192, %s29_s13, [#allocation6], %s4056_s24, %s4056_s24, %s4057_s25  }
  0x14   :  { %s3982_s30 = scalar_lea.hbm %s4571_s0, 2048 }
  0x15   :  { %p3983_p8 = scmp.ne.s32.totalorder %s4571_s0, %s3982_s30  ;;  %p3986_p9 = scmp.lt.u32.totalorder %s3982_s30, %s4571_s0 }
  0x17   :  { %p3988_p10 = pnand %p3986_p9, %p3983_p8 }
  0x19   :  { %3991 = shalt.err (!%p3988_p10)
}
  0x1a   :  { %s3992_s8 = scalar_lea.vmem %s4082_s15, 2048  ;;  %p3997_p12 = scmp.lt.s32.totalorder %s4082_s15, %s4082_s15 }
  0x1b   :  { %p3993_p11 = scmp.ne.s32.totalorder %s4082_s15, %s3992_s8  ;;  %p3998_p13 = scmp.lt.s32.totalorder %s3992_s8, %s3992_s8 }
  0x1d   :  { %p3999_p0 = por %p3998_p13, %p3997_p12 }
  0x1f   :  { %p4000_p1 = pnand %p3999_p0, %p3993_p11 }
  0x21   :  { %4003 = shalt.err (!%p4000_p1)
}
  0x22   :  { %22 = dma.hbm_to_vmem [thread:$0]  %s4571_s0, 2048, %s4082_s15, [#allocation3], %s4056_s24, %s4056_s24, %s4057_s25  }
  0x23   :  { %s4058_s10 = smov [#allocation7]   ;;  %s4004_s14 = scalar_lea.hbm %s4573_s2, 128 }
  0x24   :  { %s41_s11 = sshll.u32 %s4058_s10, 4  ;;  %p4005_p2 = scmp.ne.s32.totalorder %s4573_s2, %s4004_s14  ;;  %s42_s11 = int_to_ptr.vmem [resolvable:$true] %s41_s11 }
  0x25   :  { %p4008_p3 = scmp.lt.u32.totalorder %s4004_s14, %s4573_s2 }
  0x27   :  { %p4010_p4 = pnand %p4008_p3, %p4005_p2 }
  0x29   :  { %4013 = shalt.err (!%p4010_p4)
}
  0x2a   :  { %s4014_s20 = scalar_lea.vmem %s42_s11, 128  ;;  %p4019_p6 = scmp.lt.s32.totalorder %s42_s11, %s42_s11 }
  0x2b   :  { %p4015_p5 = scmp.ne.s32.totalorder %s42_s11, %s4014_s20  ;;  %p4020_p7 = scmp.lt.s32.totalorder %s4014_s20, %s4014_s20 }
  0x2d   :  { %p4021_p8 = por %p4020_p7, %p4019_p6 }
  0x2f   :  { %p4022_p9 = pnand %p4021_p8, %p4015_p5 }
  0x31   :  { %4025 = shalt.err (!%p4022_p9)
}
  0x32   :  { %44 = dma.hbm_to_vmem [thread:$0]  %s4573_s2, 128, %s42_s11, [#allocation6]  }
  0x33   :  { %4048 = dma.done.wait [#allocation3], 2048  }
  0x34   :  { %4049 = vsyncadd [#allocation3], 4294965248 }
  0x35   :  { %4050 = dma.done.wait [#allocation6], 8320  }
  0x36   :  { %4051 = vsyncadd [#allocation6], 4294958976  ;;  %v3736_v0 = vld [vmem:[#allocation5] sm:$0xff]   ;;  %v3737_v1 = vld [vmem:[#allocation5 + $0x8] sm:$0xff]   ;;  %s4059_s2 = smov [#allocation8]  }
  0x37   :  { %3312 = vmatprep.subr.bf16.mxu0 %v3736_v0  ;;  %v3738_v2 = vld [vmem:[#allocation5 + $0x10] sm:$0xff]   ;;  %v3739_v3 = vld [vmem:[#allocation5 + $0x18] sm:$0xff]   ;;  %v3744_v4 = vld [vmem:[#allocation2] sm:$0xff]   ;;  %s2988_s21 = sshll.u32 %s4059_s2, 4  ;;  %s2989_s21 = int_to_ptr.vmem [resolvable:$true] %s2988_s21 }
  0x38   :  { %3313 = vmatpush3.bf16.msra.mxu0 %v3736_v0  ;;  %3328 = vmatprep.mubr.bf16.mxu0 %v3744_v4  ;;  %v3740_v5 = vld [vmem:[#allocation5 + $0x20] sm:$0xff]   ;;  %v3741_v6 = vld [vmem:[#allocation5 + $0x28] sm:$0xff]   ;;  %v3742_v7 = vld [vmem:[#allocation5 + $0x30] sm:$0xff]   ;;  %s4026_s22 = scalar_lea.vmem %s2989_s21, 4096  ;;  %p4031_p11 = scmp.lt.s32.totalorder %s2989_s21, %s2989_s21 }
  0x39   :  { %3314 = vmatprep.subr.bf16.mxu0 %v3737_v1  ;;  %v3743_v8 = vld [vmem:[#allocation5 + $0x38] sm:$0xff]   ;;  %v3760_v9 = vld [vmem:[#allocation5 + $0x40] sm:$0xff]   ;;  %v3761_v10 = vld [vmem:[#allocation5 + $0x48] sm:$0xff]   ;;  %p4027_p10 = scmp.ne.s32.totalorder %s2989_s21, %s4026_s22  ;;  %p4032_p12 = scmp.lt.s32.totalorder %s4026_s22, %s4026_s22 }
  0x3a   :  { %3360 = vmatprep.subr.bf16.mxu1 %v3760_v9  ;;  %v3745_v11 = vld [vmem:[#allocation2 + $0x8] sm:$0xff]   ;;  %v3762_v12 = vld [vmem:[#allocation5 + $0x50] sm:$0xff]   ;;  %v3763_v14 = vld [vmem:[#allocation5 + $0x58] sm:$0xff]  }
  0x3b   :  { %3361 = vmatpush3.bf16.msra.mxu1 %v3760_v9  ;;  %v3746_v13 = vld [vmem:[#allocation2 + $0x10] sm:$0xff]   ;;  %v3764_v15 = vld [vmem:[#allocation5 + $0x60] sm:$0xff]   ;;  %v3747_v16 = vld [vmem:[#allocation2 + $0x18] sm:$0xff]   ;;  %p4033_p13 = por %p4032_p12, %p4031_p11 }
  0x3c   :  { %3315 = vmatpush3.bf16.msra.mxu0 %v3737_v1  ;;  %3362 = vmatprep.subr.bf16.mxu1 %v3761_v10  ;;  %v3748_v17 = vld [vmem:[#allocation2 + $0x20] sm:$0xff]   ;;  %v3749_v18 = vld [vmem:[#allocation2 + $0x28] sm:$0xff]   ;;  %v3750_v19 = vld [vmem:[#allocation2 + $0x30] sm:$0xff]  }
  0x3d   :  { %3316 = vmatprep.subr.bf16.mxu0 %v3738_v2  ;;  %v3751_v20 = vld [vmem:[#allocation2 + $0x38] sm:$0xff]   ;;  %v3752_v21 = vld [vmem:[#allocation2 + $0x40] sm:$0xff]   ;;  %v3753_v22 = vld [vmem:[#allocation2 + $0x48] sm:$0xff]   ;;  %p4034_p0 = pnand %p4033_p13, %p4027_p10 }
  0x3e   :  { %v3754_v23 = vld [vmem:[#allocation2 + $0x50] sm:$0xff]   ;;  %v3755_v24 = vld [vmem:[#allocation2 + $0x58] sm:$0xff]   ;;  %v3756_v25 = vld [vmem:[#allocation2 + $0x60] sm:$0xff]  }
  0x3f   :  { %3363 = vmatpush3.bf16.msra.mxu1 %v3761_v10  ;;  %v3757_v26 = vld [vmem:[#allocation2 + $0x68] sm:$0xff]   ;;  %v3758_v27 = vld [vmem:[#allocation2 + $0x70] sm:$0xff]   ;;  %v3759_v28 = vld [vmem:[#allocation2 + $0x78] sm:$0xff]  }
  0x40   :  { %3317 = vmatpush3.bf16.msra.mxu0 %v3738_v2  ;;  %3364 = vmatprep.subr.bf16.mxu1 %v3762_v12  ;;  %v3765_v29 = vld [vmem:[#allocation5 + $0x68] sm:$0xff]   ;;  %v3766_v30 = vld [vmem:[#allocation5 + $0x70] sm:$0xff]   ;;  %v3767_v31 = vld [vmem:[#allocation5 + $0x78] sm:$0xff]  }
  0x41   :  { %3318 = vmatprep.subr.bf16.mxu0 %v3739_v3  ;;  %v3768_v32 = vld [vmem:[#allocation5 + $0x80] sm:$0xff]   ;;  %v3769_v33 = vld [vmem:[#allocation5 + $0x88] sm:$0xff]   ;;  %v3770_v34 = vld [vmem:[#allocation5 + $0x90] sm:$0xff]  }
  0x42   :  { %v3771_v35 = vld [vmem:[#allocation5 + $0x98] sm:$0xff]   ;;  %v3772_v36 = vld [vmem:[#allocation5 + $0xa0] sm:$0xff]   ;;  %v3773_v37 = vld [vmem:[#allocation5 + $0xa8] sm:$0xff]  }
  0x43   :  { %3365 = vmatpush3.bf16.msra.mxu1 %v3762_v12  ;;  %v3774_v38 = vld [vmem:[#allocation5 + $0xb0] sm:$0xff]   ;;  %v4125_v39 = vld [vmem:[#allocation7] ss:$0 sm:$0xff] }
  0x44   :  { %3319 = vmatpush3.bf16.msra.mxu0 %v3739_v3  ;;  %3366 = vmatprep.subr.bf16.mxu1 %v3763_v14 }
  0x45   :  { %3320 = vmatprep.subr.bf16.mxu0 %v3740_v5 }
  0x47   :  { %3367 = vmatpush3.bf16.msra.mxu1 %v3763_v14 }
  0x48   :  { %3321 = vmatpush3.bf16.msra.mxu0 %v3740_v5  ;;  %3368 = vmatprep.subr.bf16.mxu1 %v3764_v15 }
  0x49   :  { %3322 = vmatprep.subr.bf16.mxu0 %v3741_v6 }
  0x4b   :  { %3369 = vmatpush3.bf16.msra.mxu1 %v3764_v15 }
  0x4c   :  { %3323 = vmatpush3.bf16.msra.mxu0 %v3741_v6  ;;  %3370 = vmatprep.subr.bf16.mxu1 %v3765_v29 }
  0x4d   :  { %3324 = vmatprep.subr.bf16.mxu0 %v3742_v7 }
  0x4f   :  { %3371 = vmatpush3.bf16.msra.mxu1 %v3765_v29 }
  0x50   :  { %3325 = vmatpush3.bf16.msra.mxu0 %v3742_v7  ;;  %3372 = vmatprep.subr.bf16.mxu1 %v3766_v30 }
  0x51   :  { %3326 = vmatprep.subr.bf16.mxu0 %v3743_v8 }
  0x53   :  { %3373 = vmatpush3.bf16.msra.mxu1 %v3766_v30 }
  0x54   :  { %3327 = vmatpush3.bf16.msra.mxu0 %v3743_v8  ;;  %3374 = vmatprep.subr.bf16.mxu1 %v3767_v31 }
  0x55   :  { %3408 = vmatprep.subr.bf16.mxu0 %v3768_v32 }
  0x57   :  { %3329 = vmatmul.mubr.bf16.vlgmr.msra.gmra.mrb[0].mxu0 %v3745_v11  ;;  %3375 = vmatpush3.bf16.msra.mxu1 %v3767_v31 }
  0x58   :  { %3332 = vmatprep.mubr.bf16.mxu0 %v3746_v13  ;;  %3409 = vmatpush3.bf16.msra.mxu0 %v3768_v32 }
  0x59   :  { %3410 = vmatprep.subr.bf16.mxu0 %v3769_v33 }
  0x5c   :  { %3411 = vmatpush3.bf16.msra.mxu0 %v3769_v33 }
  0x5d   :  { %3412 = vmatprep.subr.bf16.mxu0 %v3770_v34 }
  0x5f   :  { %3333 = vmatmul.mubr.bf16.gmra.mrb[4].mxu0 %v3747_v16 }
  0x60   :  { %3336 = vmatprep.mubr.bf16.mxu0 %v3748_v17  ;;  %3413 = vmatpush3.bf16.msra.mxu0 %v3770_v34 }
  0x61   :  { %3414 = vmatprep.subr.bf16.mxu0 %v3771_v35 }
  0x64   :  { %3415 = vmatpush3.bf16.msra.mxu0 %v3771_v35 }
  0x65   :  { %3416 = vmatprep.subr.bf16.mxu0 %v3772_v36 }
  0x67   :  { %3337 = vmatmul.mubr.bf16.gmra.mrb[8].mxu0 %v3749_v18 }
  0x68   :  { %3340 = vmatprep.mubr.bf16.mxu0 %v3750_v19  ;;  %3417 = vmatpush3.bf16.msra.mxu0 %v3772_v36 }
  0x69   :  { %3418 = vmatprep.subr.bf16.mxu0 %v3773_v37 }
  0x6c   :  { %3419 = vmatpush3.bf16.msra.mxu0 %v3773_v37 }
  0x6d   :  { %3420 = vmatprep.subr.bf16.mxu0 %v3774_v38 }
  0x6f   :  { %3341 = vmatmul.mubr.bf16.gmra.mrb[12].mxu0 %v3751_v20 }
  0x70   :  { %3344 = vmatprep.mubr.bf16.mxu0 %v3752_v21  ;;  %3421 = vmatpush3.bf16.msra.mxu0 %v3774_v38 }
  0x77   :  { %3345 = vmatmul.mubr.bf16.gmra.mrb[16].mxu0 %v3753_v22 }
  0x78   :  { %3348 = vmatprep.mubr.bf16.mxu0 %v3754_v23 }
  0x7f   :  { %3349 = vmatmul.mubr.bf16.gmra.mrb[20].mxu0 %v3755_v24 }
  0x80   :  { %3352 = vmatprep.mubr.bf16.mxu0 %v3756_v25 }
  0x87   :  { %3353 = vmatmul.mubr.bf16.gmra.mrb[24].mxu0 %v3757_v26 }
  0x88   :  { %3356 = vmatprep.mubr.bf16.mxu0 %v3758_v27 }
  0x8f   :  { %3357 = vmatmul.mubr.bf16.gmra.mrb[28].mxu0 %v3759_v28 }
 0x12a   :  { %v3330_v40 = vpop.f32.mrb[0].mxu0 }
 0x12b   :  { %v295_v41 = vadd.f32 %v3330_v40, %v4125_v39  ;;  %v286_v42 = vpop.f32.mrb[1].mxu0 }
 0x12c   :  { %v287_v43 = vadd.f32 %v4125_v39, %v286_v42  ;;  %v3331_v44 = vpop.f32.mrb[2].mxu0 }
 0x12d   :  { %v447_v45 = vmul.f32 0.2, %v295_v41  ;;  %v298_v46 = vadd.f32 %v3331_v44, %v4125_v39  ;;  %v289_v47 = vpop.f32.mrb[3].mxu0  ;;  %vm415_vm0 = vcmp.gt.f32.partialorder %v295_v41, 0.0 }
 0x12e   :  { %v445_v48 = vmul.f32 0.2, %v287_v43  ;;  %v290_v49 = vadd.f32 %v4125_v39, %v289_v47  ;;  %vm413_vm2 = vcmp.gt.f32.partialorder %v287_v43, 0.0 }
 0x12f   :  { %vm416_vm1 = vcmp.gt.f32.partialorder %v298_v46, 0.0  ;;  %v448_v50 = vmul.f32 0.2, %v298_v46  ;;  %v479_v52 = vsel %vm415_vm0, %v295_v41, %v447_v45 }
 0x130   :  { %v446_v51 = vmul.f32 0.2, %v290_v49  ;;  %vm414_vm3 = vcmp.gt.f32.partialorder %v290_v49, 0.0  ;;  %v477_v55 = vsel %vm413_vm2, %v287_v43, %v445_v48 }
 0x131   :  { %v480_v53 = vsel %vm416_vm1, %v298_v46, %v448_v50 }
 0x132   :  { %v3334_v54 = vpop.f32.mrb[4].mxu0  ;;  %v478_v56 = vsel %vm414_vm3, %v290_v49, %v446_v51  ;;  %v510_v57 = vpack.c.bf16 %v480_v53, %v479_v52 }
 0x133   :  { %v311_v58 = vadd.f32 %v3334_v54, %v4125_v39  ;;  %v302_v59 = vpop.f32.mrb[5].mxu0  ;;  %v509_v60 = vpack.c.bf16 %v478_v56, %v477_v55 }
 0x134   :  { %v303_v61 = vadd.f32 %v4125_v39, %v302_v59  ;;  %v3335_v62 = vpop.f32.mrb[6].mxu0 }
 0x135   :  { %v451_v63 = vmul.f32 0.2, %v311_v58  ;;  %v314_v0 = vadd.f32 %v3335_v62, %v4125_v39  ;;  %v305_v1 = vpop.f32.mrb[7].mxu0  ;;  %3376 = vmatprep.mubr.bf16.mxu1 %v509_v60  ;;  %vm419_vm4 = vcmp.gt.f32.partialorder %v311_v58, 0.0 }
 0x136   :  { %v449_v2 = vmul.f32 0.2, %v303_v61  ;;  %v306_v3 = vadd.f32 %v4125_v39, %v305_v1  ;;  %3377 = vmatmul.mubr.bf16.vlgmr.msra.gmra.mrb[0].mxu1 %v510_v57  ;;  %vm417_vm5 = vcmp.gt.f32.partialorder %v303_v61, 0.0 }
 0x137   :  { %vm420_vm6 = vcmp.gt.f32.partialorder %v314_v0, 0.0  ;;  %v452_v4 = vmul.f32 0.2, %v314_v0  ;;  %v483_v6 = vsel %vm419_vm4, %v311_v58, %v451_v63 }
 0x138   :  { %vm418_vm7 = vcmp.gt.f32.partialorder %v306_v3, 0.0  ;;  %v450_v5 = vmul.f32 0.2, %v306_v3  ;;  %v481_v9 = vsel %vm417_vm5, %v303_v61, %v449_v2 }
 0x139   :  { %v484_v7 = vsel %vm420_vm6, %v314_v0, %v452_v4 }
 0x13a   :  { %v3338_v8 = vpop.f32.mrb[8].mxu0  ;;  %v482_v10 = vsel %vm418_vm7, %v306_v3, %v450_v5  ;;  %v512_v11 = vpack.c.bf16 %v484_v7, %v483_v6 }
 0x13b   :  { %v327_v12 = vadd.f32 %v3338_v8, %v4125_v39  ;;  %v318_v13 = vpop.f32.mrb[9].mxu0  ;;  %v511_v14 = vpack.c.bf16 %v482_v10, %v481_v9 }
 0x13c   :  { %v319_v15 = vadd.f32 %v4125_v39, %v318_v13  ;;  %v3339_v16 = vpop.f32.mrb[10].mxu0 }
 0x13d   :  { %v455_v17 = vmul.f32 0.2, %v327_v12  ;;  %v330_v18 = vadd.f32 %v3339_v16, %v4125_v39  ;;  %v321_v19 = vpop.f32.mrb[11].mxu0  ;;  %3380 = vmatprep.mubr.bf16.mxu1 %v511_v14  ;;  %vm423_vm8 = vcmp.gt.f32.partialorder %v327_v12, 0.0 }
 0x13e   :  { %v453_v20 = vmul.f32 0.2, %v319_v15  ;;  %v322_v21 = vadd.f32 %v4125_v39, %v321_v19  ;;  %3381 = vmatmul.mubr.bf16.gmra.mrb[4].mxu1 %v512_v11  ;;  %vm421_vm9 = vcmp.gt.f32.partialorder %v319_v15, 0.0 }
 0x13f   :  { %vm424_vm10 = vcmp.gt.f32.partialorder %v330_v18, 0.0  ;;  %v456_v22 = vmul.f32 0.2, %v330_v18  ;;  %v487_v24 = vsel %vm423_vm8, %v327_v12, %v455_v17 }
 0x140   :  { %vm422_vm11 = vcmp.gt.f32.partialorder %v322_v21, 0.0  ;;  %v454_v23 = vmul.f32 0.2, %v322_v21  ;;  %v485_v27 = vsel %vm421_vm9, %v319_v15, %v453_v20 }
 0x141   :  { %v488_v25 = vsel %vm424_vm10, %v330_v18, %v456_v22 }
 0x142   :  { %v3342_v26 = vpop.f32.mrb[12].mxu0  ;;  %v486_v28 = vsel %vm422_vm11, %v322_v21, %v454_v23  ;;  %v514_v29 = vpack.c.bf16 %v488_v25, %v487_v24 }
 0x143   :  { %v343_v30 = vadd.f32 %v3342_v26, %v4125_v39  ;;  %v334_v31 = vpop.f32.mrb[13].mxu0  ;;  %v513_v32 = vpack.c.bf16 %v486_v28, %v485_v27 }
 0x144   :  { %v335_v33 = vadd.f32 %v4125_v39, %v334_v31  ;;  %v3343_v34 = vpop.f32.mrb[14].mxu0 }
 0x145   :  { %v459_v35 = vmul.f32 0.2, %v343_v30  ;;  %v346_v36 = vadd.f32 %v3343_v34, %v4125_v39  ;;  %v337_v37 = vpop.f32.mrb[15].mxu0  ;;  %3384 = vmatprep.mubr.bf16.mxu1 %v513_v32  ;;  %vm427_vm12 = vcmp.gt.f32.partialorder %v343_v30, 0.0 }
 0x146   :  { %v457_v38 = vmul.f32 0.2, %v335_v33  ;;  %v338_v40 = vadd.f32 %v4125_v39, %v337_v37  ;;  %3385 = vmatmul.mubr.bf16.gmra.mrb[8].mxu1 %v514_v29  ;;  %vm425_vm13 = vcmp.gt.f32.partialorder %v335_v33, 0.0 }
 0x147   :  { %vm428_vm14 = vcmp.gt.f32.partialorder %v346_v36, 0.0  ;;  %v460_v41 = vmul.f32 0.2, %v346_v36  ;;  %v491_v43 = vsel %vm427_vm12, %v343_v30, %v459_v35 }
 0x148   :  { %vm426_vm15 = vcmp.gt.f32.partialorder %v338_v40, 0.0  ;;  %v458_v42 = vmul.f32 0.2, %v338_v40  ;;  %v489_v46 = vsel %vm425_vm13, %v335_v33, %v457_v38 }
 0x149   :  { %v492_v44 = vsel %vm428_vm14, %v346_v36, %v460_v41 }
 0x14a   :  { %v3346_v45 = vpop.f32.mrb[16].mxu0  ;;  %v490_v47 = vsel %vm426_vm15, %v338_v40, %v458_v42  ;;  %v516_v48 = vpack.c.bf16 %v492_v44, %v491_v43 }
 0x14b   :  { %v359_v49 = vadd.f32 %v3346_v45, %v4125_v39  ;;  %v350_v50 = vpop.f32.mrb[17].mxu0  ;;  %v515_v51 = vpack.c.bf16 %v490_v47, %v489_v46 }
 0x14c   :  { %v351_v52 = vadd.f32 %v4125_v39, %v350_v50  ;;  %v3347_v53 = vpop.f32.mrb[18].mxu0 }
 0x14d   :  { %v463_v54 = vmul.f32 0.2, %v359_v49  ;;  %v362_v55 = vadd.f32 %v3347_v53, %v4125_v39  ;;  %v353_v56 = vpop.f32.mrb[19].mxu0  ;;  %3388 = vmatprep.mubr.bf16.mxu1 %v515_v51  ;;  %vm431_vm0 = vcmp.gt.f32.partialorder %v359_v49, 0.0 }
 0x14e   :  { %v461_v57 = vmul.f32 0.2, %v351_v52  ;;  %v354_v58 = vadd.f32 %v4125_v39, %v353_v56  ;;  %3389 = vmatmul.mubr.bf16.gmra.mrb[12].mxu1 %v516_v48  ;;  %vm429_vm1 = vcmp.gt.f32.partialorder %v351_v52, 0.0 }
 0x14f   :  { %vm432_vm2 = vcmp.gt.f32.partialorder %v362_v55, 0.0  ;;  %v464_v59 = vmul.f32 0.2, %v362_v55  ;;  %v495_v61 = vsel %vm431_vm0, %v359_v49, %v463_v54 }
 0x150   :  { %vm430_vm3 = vcmp.gt.f32.partialorder %v354_v58, 0.0  ;;  %v462_v60 = vmul.f32 0.2, %v354_v58  ;;  %v493_v0 = vsel %vm429_vm1, %v351_v52, %v461_v57 }
 0x151   :  { %v496_v62 = vsel %vm432_vm2, %v362_v55, %v464_v59  ;;  %v3776_v59 = vld [vmem:[#allocation5 + $0x100] sm:$0xff]  }
 0x152   :  { %v3350_v63 = vpop.f32.mrb[20].mxu0  ;;  %v494_v1 = vsel %vm430_vm3, %v354_v58, %v462_v60  ;;  %v518_v2 = vpack.c.bf16 %v496_v62, %v495_v61  ;;  %v3775_v58 = vld [vmem:[#allocation5 + $0xb8] sm:$0xff]   ;;  %v3777_v60 = vld [vmem:[#allocation5 + $0x108] sm:$0xff]   ;;  %3456 = vmatprep.subr.bf16.mxu1 %v3776_v59  ;;  %v3780_v62 = vld [vmem:[#allocation5 + $0x120] sm:$0xff]  }
 0x153   :  { %v375_v3 = vadd.f32 %v3350_v63, %v4125_v39  ;;  %v366_v4 = vpop.f32.mrb[21].mxu0  ;;  %v517_v5 = vpack.c.bf16 %v494_v1, %v493_v0  ;;  %3422 = vmatprep.subr.bf16.mxu0 %v3775_v58  ;;  %3457 = vmatpush3.bf16.msra.mxu1 %v3776_v59  ;;  %v3779_v61 = vld [vmem:[#allocation5 + $0x118] sm:$0xff]   ;;  %v3781_v63 = vld [vmem:[#allocation5 + $0x128] sm:$0xff]   ;;  %v3782_v0 = vld [vmem:[#allocation5 + $0x130] sm:$0xff]  }
 0x154   :  { %v367_v6 = vadd.f32 %v4125_v39, %v366_v4  ;;  %v3351_v7 = vpop.f32.mrb[22].mxu0  ;;  %3423 = vmatpush3.bf16.msra.mxu0 %v3775_v58  ;;  %3458 = vmatprep.subr.bf16.mxu1 %v3777_v60  ;;  %v4159_v1 = vld [vmem:[#allocation7 + $0x1] ss:$0 sm:$0xff] }
 0x155   :  { %v467_v8 = vmul.f32 0.2, %v375_v3  ;;  %v378_v9 = vadd.f32 %v3351_v7, %v4125_v39  ;;  %v369_v10 = vpop.f32.mrb[23].mxu0  ;;  %3392 = vmatprep.mubr.bf16.mxu1 %v517_v5  ;;  %vm435_vm4 = vcmp.gt.f32.partialorder %v375_v3, 0.0 }
 0x156   :  { %v465_v11 = vmul.f32 0.2, %v367_v6  ;;  %v370_v12 = vadd.f32 %v4125_v39, %v369_v10  ;;  %3393 = vmatmul.mubr.bf16.gmra.mrb[16].mxu1 %v518_v2  ;;  %vm433_vm5 = vcmp.gt.f32.partialorder %v367_v6, 0.0 }
 0x157   :  { %vm436_vm6 = vcmp.gt.f32.partialorder %v378_v9, 0.0  ;;  %v468_v13 = vmul.f32 0.2, %v378_v9  ;;  %v499_v15 = vsel %vm435_vm4, %v375_v3, %v467_v8  ;;  %3459 = vmatpush3.bf16.msra.mxu1 %v3777_v60 }
 0x158   :  { %vm434_vm7 = vcmp.gt.f32.partialorder %v370_v12, 0.0  ;;  %v466_v14 = vmul.f32 0.2, %v370_v12  ;;  %v497_v18 = vsel %vm433_vm5, %v367_v6, %v465_v11 }
 0x159   :  { %v500_v16 = vsel %vm436_vm6, %v378_v9, %v468_v13 }
 0x15a   :  { %v3354_v17 = vpop.f32.mrb[24].mxu0  ;;  %v498_v19 = vsel %vm434_vm7, %v370_v12, %v466_v14  ;;  %v520_v20 = vpack.c.bf16 %v500_v16, %v499_v15 }
 0x15b   :  { %v391_v21 = vadd.f32 %v3354_v17, %v4125_v39  ;;  %v382_v22 = vpop.f32.mrb[25].mxu0  ;;  %v519_v23 = vpack.c.bf16 %v498_v19, %v497_v18 }
 0x15c   :  { %v383_v24 = vadd.f32 %v4125_v39, %v382_v22  ;;  %v3355_v25 = vpop.f32.mrb[26].mxu0 }
 0x15d   :  { %v471_v26 = vmul.f32 0.2, %v391_v21  ;;  %v394_v27 = vadd.f32 %v3355_v25, %v4125_v39  ;;  %v385_v28 = vpop.f32.mrb[27].mxu0  ;;  %3396 = vmatprep.mubr.bf16.mxu1 %v519_v23  ;;  %vm439_vm8 = vcmp.gt.f32.partialorder %v391_v21, 0.0 }
 0x15e   :  { %v469_v29 = vmul.f32 0.2, %v383_v24  ;;  %v386_v30 = vadd.f32 %v4125_v39, %v385_v28  ;;  %3397 = vmatmul.mubr.bf16.gmra.mrb[20].mxu1 %v520_v20  ;;  %vm437_vm9 = vcmp.gt.f32.partialorder %v383_v24, 0.0 }
 0x15f   :  { %vm440_vm10 = vcmp.gt.f32.partialorder %v394_v27, 0.0  ;;  %v472_v31 = vmul.f32 0.2, %v394_v27  ;;  %v503_v33 = vsel %vm439_vm8, %v391_v21, %v471_v26 }
 0x160   :  { %vm438_vm11 = vcmp.gt.f32.partialorder %v386_v30, 0.0  ;;  %v470_v32 = vmul.f32 0.2, %v386_v30  ;;  %v501_v36 = vsel %vm437_vm9, %v383_v24, %v469_v29 }
 0x161   :  { %v504_v34 = vsel %vm440_vm10, %v394_v27, %v472_v31 }
 0x162   :  { %v3358_v35 = vpop.f32.mrb[28].mxu0  ;;  %v502_v37 = vsel %vm438_vm11, %v386_v30, %v470_v32  ;;  %v522_v38 = vpack.c.bf16 %v504_v34, %v503_v33 }
 0x163   :  { %v407_v40 = vadd.f32 %v3358_v35, %v4125_v39  ;;  %v398_v41 = vpop.f32.mrb[29].mxu0  ;;  %v521_v42 = vpack.c.bf16 %v502_v37, %v501_v36 }
 0x164   :  { %v399_v43 = vadd.f32 %v4125_v39, %v398_v41  ;;  %v3359_v44 = vpop.f32.mrb[30].mxu0 }
 0x165   :  { %v475_v45 = vmul.f32 0.2, %v407_v40  ;;  %v410_v46 = vadd.f32 %v3359_v44, %v4125_v39  ;;  %v401_v47 = vpop.f32.mrb[31].mxu0  ;;  %3400 = vmatprep.mubr.bf16.mxu1 %v521_v42  ;;  %vm443_vm12 = vcmp.gt.f32.partialorder %v407_v40, 0.0 }
 0x166   :  { %v473_v48 = vmul.f32 0.2, %v399_v43  ;;  %v402_v49 = vadd.f32 %v4125_v39, %v401_v47  ;;  %3401 = vmatmul.mubr.bf16.gmra.mrb[24].mxu1 %v522_v38  ;;  %vm441_vm13 = vcmp.gt.f32.partialorder %v399_v43, 0.0  ;;  %v3778_v39 = vld [vmem:[#allocation5 + $0x110] sm:$0xff]  }
 0x167   :  { %vm444_vm14 = vcmp.gt.f32.partialorder %v410_v46, 0.0  ;;  %v476_v50 = vmul.f32 0.2, %v410_v46  ;;  %v507_v52 = vsel %vm443_vm12, %v407_v40, %v475_v45  ;;  %3460 = vmatprep.subr.bf16.mxu1 %v3778_v39 }
 0x168   :  { %vm442_vm15 = vcmp.gt.f32.partialorder %v402_v49, 0.0  ;;  %v474_v51 = vmul.f32 0.2, %v402_v49  ;;  %v505_v54 = vsel %vm441_vm13, %v399_v43, %v473_v48  ;;  %3461 = vmatpush3.bf16.msra.mxu1 %v3778_v39 }
 0x169   :  { %v508_v53 = vsel %vm444_vm14, %v410_v46, %v476_v50  ;;  %3462 = vmatprep.subr.bf16.mxu1 %v3779_v61 }
 0x16a   :  { %v506_v55 = vsel %vm442_vm15, %v402_v49, %v474_v51  ;;  %v524_v56 = vpack.c.bf16 %v508_v53, %v507_v52 }
 0x16b   :  { %v523_v57 = vpack.c.bf16 %v506_v55, %v505_v54 }
 0x16c   :  { %3463 = vmatpush3.bf16.msra.mxu1 %v3779_v61 }
 0x16d   :  { %3404 = vmatprep.mubr.bf16.mxu1 %v523_v57  ;;  %3464 = vmatprep.subr.bf16.mxu1 %v3780_v62 }
 0x16e   :  { %3405 = vmatmul.mubr.bf16.gmra.mrb[28].mxu1 %v524_v56 }
 0x170   :  { %3465 = vmatpush3.bf16.msra.mxu1 %v3780_v62 }
 0x171   :  { %3466 = vmatprep.subr.bf16.mxu1 %v3781_v63 }
 0x174   :  { %3467 = vmatpush3.bf16.msra.mxu1 %v3781_v63 }
 0x175   :  { %3468 = vmatprep.subr.bf16.mxu1 %v3782_v0 }
 0x178   :  { %3469 = vmatpush3.bf16.msra.mxu1 %v3782_v0 }
 0x209   :  { %v3378_v2 = vpop.f32.mrb[0].mxu1 }
 0x20a   :  { %v637_v3 = vadd.f32 %v3378_v2, %v4159_v1  ;;  %v628_v4 = vpop.f32.mrb[1].mxu1 }
 0x20b   :  { %v629_v5 = vadd.f32 %v4159_v1, %v628_v4  ;;  %v3379_v6 = vpop.f32.mrb[2].mxu1 }
 0x20c   :  { %v789_v7 = vmul.f32 0.2, %v637_v3  ;;  %v640_v8 = vadd.f32 %v3379_v6, %v4159_v1  ;;  %v631_v9 = vpop.f32.mrb[3].mxu1  ;;  %vm757_vm0 = vcmp.gt.f32.partialorder %v637_v3, 0.0 }
 0x20d   :  { %v787_v10 = vmul.f32 0.2, %v629_v5  ;;  %v632_v11 = vadd.f32 %v4159_v1, %v631_v9  ;;  %vm755_vm1 = vcmp.gt.f32.partialorder %v629_v5, 0.0 }
 0x20e   :  { %vm758_vm2 = vcmp.gt.f32.partialorder %v640_v8, 0.0  ;;  %v790_v12 = vmul.f32 0.2, %v640_v8  ;;  %v821_v14 = vsel %vm757_vm0, %v637_v3, %v789_v7 }
 0x20f   :  { %vm756_vm3 = vcmp.gt.f32.partialorder %v632_v11, 0.0  ;;  %v788_v13 = vmul.f32 0.2, %v632_v11  ;;  %v819_v18 = vsel %vm755_vm1, %v629_v5, %v787_v10 }
 0x210   :  { %v822_v15 = vsel %vm758_vm2, %v640_v8, %v790_v12 }
 0x211   :  { %v852_v16 = vpack.c.bf16 %v822_v15, %v821_v14  ;;  %v3382_v17 = vpop.f32.mrb[4].mxu1  ;;  %v820_v19 = vsel %vm756_vm3, %v632_v11, %v788_v13 }
 0x212   :  { %v653_v20 = vadd.f32 %v3382_v17, %v4159_v1  ;;  %v644_v21 = vpop.f32.mrb[5].mxu1  ;;  %v851_v22 = vpack.c.bf16 %v820_v19, %v819_v18 }
 0x213   :  { %v645_v23 = vadd.f32 %v4159_v1, %v644_v21  ;;  %v3383_v24 = vpop.f32.mrb[6].mxu1 }
 0x214   :  { %v793_v25 = vmul.f32 0.2, %v653_v20  ;;  %v656_v26 = vadd.f32 %v3383_v24, %v4159_v1  ;;  %v647_v27 = vpop.f32.mrb[7].mxu1  ;;  %3424 = vmatprep.mubr.bf16.mxu0 %v851_v22  ;;  %vm761_vm4 = vcmp.gt.f32.partialorder %v653_v20, 0.0 }
 0x215   :  { %v791_v28 = vmul.f32 0.2, %v645_v23  ;;  %v648_v29 = vadd.f32 %v4159_v1, %v647_v27  ;;  %3425 = vmatmul.mubr.bf16.vlgmr.msra.gmra.mrb[32].mxu0 %v852_v16  ;;  %vm759_vm5 = vcmp.gt.f32.partialorder %v645_v23, 0.0 }
 0x216   :  { %vm762_vm6 = vcmp.gt.f32.partialorder %v656_v26, 0.0  ;;  %v794_v30 = vmul.f32 0.2, %v656_v26  ;;  %v825_v32 = vsel %vm761_vm4, %v653_v20, %v793_v25 }
 0x217   :  { %vm760_vm7 = vcmp.gt.f32.partialorder %v648_v29, 0.0  ;;  %v792_v31 = vmul.f32 0.2, %v648_v29  ;;  %v823_v35 = vsel %vm759_vm5, %v645_v23, %v791_v28 }
 0x218   :  { %v826_v33 = vsel %vm762_vm6, %v656_v26, %v794_v30 }
 0x219   :  { %v3386_v34 = vpop.f32.mrb[8].mxu1  ;;  %v824_v36 = vsel %vm760_vm7, %v648_v29, %v792_v31  ;;  %v854_v37 = vpack.c.bf16 %v826_v33, %v825_v32 }
 0x21a   :  { %v669_v38 = vadd.f32 %v3386_v34, %v4159_v1  ;;  %v660_v40 = vpop.f32.mrb[9].mxu1  ;;  %v853_v41 = vpack.c.bf16 %v824_v36, %v823_v35 }
 0x21b   :  { %v661_v42 = vadd.f32 %v4159_v1, %v660_v40  ;;  %v3387_v43 = vpop.f32.mrb[10].mxu1 }
 0x21c   :  { %v797_v44 = vmul.f32 0.2, %v669_v38  ;;  %v672_v45 = vadd.f32 %v3387_v43, %v4159_v1  ;;  %v663_v46 = vpop.f32.mrb[11].mxu1  ;;  %3428 = vmatprep.mubr.bf16.mxu0 %v853_v41  ;;  %vm765_vm8 = vcmp.gt.f32.partialorder %v669_v38, 0.0 }
 0x21d   :  { %v795_v47 = vmul.f32 0.2, %v661_v42  ;;  %v664_v48 = vadd.f32 %v4159_v1, %v663_v46  ;;  %3429 = vmatmul.mubr.bf16.gmra.mrb[36].mxu0 %v854_v37  ;;  %vm763_vm9 = vcmp.gt.f32.partialorder %v661_v42, 0.0 }
 0x21e   :  { %vm766_vm10 = vcmp.gt.f32.partialorder %v672_v45, 0.0  ;;  %v798_v49 = vmul.f32 0.2, %v672_v45  ;;  %v829_v51 = vsel %vm765_vm8, %v669_v38, %v797_v44 }
 0x21f   :  { %vm764_vm11 = vcmp.gt.f32.partialorder %v664_v48, 0.0  ;;  %v796_v50 = vmul.f32 0.2, %v664_v48  ;;  %v827_v54 = vsel %vm763_vm9, %v661_v42, %v795_v47 }
 0x220   :  { %v830_v52 = vsel %vm766_vm10, %v672_v45, %v798_v49 }
 0x221   :  { %v3390_v53 = vpop.f32.mrb[12].mxu1  ;;  %v828_v55 = vsel %vm764_vm11, %v664_v48, %v796_v50  ;;  %v856_v56 = vpack.c.bf16 %v830_v52, %v829_v51 }
 0x222   :  { %v685_v57 = vadd.f32 %v3390_v53, %v4159_v1  ;;  %v676_v58 = vpop.f32.mrb[13].mxu1  ;;  %v855_v59 = vpack.c.bf16 %v828_v55, %v827_v54 }
 0x223   :  { %v677_v60 = vadd.f32 %v4159_v1, %v676_v58  ;;  %v3391_v39 = vpop.f32.mrb[14].mxu1 }
 0x224   :  { %v801_v61 = vmul.f32 0.2, %v685_v57  ;;  %v688_v62 = vadd.f32 %v3391_v39, %v4159_v1  ;;  %v679_v63 = vpop.f32.mrb[15].mxu1  ;;  %3432 = vmatprep.mubr.bf16.mxu0 %v855_v59  ;;  %vm769_vm12 = vcmp.gt.f32.partialorder %v685_v57, 0.0 }
 0x225   :  { %v799_v0 = vmul.f32 0.2, %v677_v60  ;;  %v680_v2 = vadd.f32 %v4159_v1, %v679_v63  ;;  %3433 = vmatmul.mubr.bf16.gmra.mrb[40].mxu0 %v856_v56  ;;  %vm767_vm13 = vcmp.gt.f32.partialorder %v677_v60, 0.0 }
 0x226   :  { %vm770_vm14 = vcmp.gt.f32.partialorder %v688_v62, 0.0  ;;  %v802_v3 = vmul.f32 0.2, %v688_v62  ;;  %v833_v5 = vsel %vm769_vm12, %v685_v57, %v801_v61 }
 0x227   :  { %vm768_vm15 = vcmp.gt.f32.partialorder %v680_v2, 0.0  ;;  %v800_v4 = vmul.f32 0.2, %v680_v2  ;;  %v831_v8 = vsel %vm767_vm13, %v677_v60, %v799_v0 }
 0x228   :  { %v834_v6 = vsel %vm770_vm14, %v688_v62, %v802_v3 }
 0x229   :  { %v3394_v7 = vpop.f32.mrb[16].mxu1  ;;  %v832_v9 = vsel %vm768_vm15, %v680_v2, %v800_v4  ;;  %v858_v10 = vpack.c.bf16 %v834_v6, %v833_v5 }
 0x22a   :  { %v701_v11 = vadd.f32 %v3394_v7, %v4159_v1  ;;  %v692_v12 = vpop.f32.mrb[17].mxu1  ;;  %v857_v13 = vpack.c.bf16 %v832_v9, %v831_v8 }
 0x22b   :  { %v693_v14 = vadd.f32 %v4159_v1, %v692_v12  ;;  %v3395_v15 = vpop.f32.mrb[18].mxu1 }
 0x22c   :  { %v805_v16 = vmul.f32 0.2, %v701_v11  ;;  %v704_v17 = vadd.f32 %v3395_v15, %v4159_v1  ;;  %v695_v18 = vpop.f32.mrb[19].mxu1  ;;  %3436 = vmatprep.mubr.bf16.mxu0 %v857_v13  ;;  %vm773_vm0 = vcmp.gt.f32.partialorder %v701_v11, 0.0 }
 0x22d   :  { %v803_v19 = vmul.f32 0.2, %v693_v14  ;;  %v696_v20 = vadd.f32 %v4159_v1, %v695_v18  ;;  %3437 = vmatmul.mubr.bf16.gmra.mrb[44].mxu0 %v858_v10  ;;  %vm771_vm1 = vcmp.gt.f32.partialorder %v693_v14, 0.0 }
 0x22e   :  { %vm774_vm2 = vcmp.gt.f32.partialorder %v704_v17, 0.0  ;;  %v806_v21 = vmul.f32 0.2, %v704_v17  ;;  %v837_v23 = vsel %vm773_vm0, %v701_v11, %v805_v16 }
 0x22f   :  { %vm772_vm3 = vcmp.gt.f32.partialorder %v696_v20, 0.0  ;;  %v804_v22 = vmul.f32 0.2, %v696_v20  ;;  %v835_v26 = vsel %vm771_vm1, %v693_v14, %v803_v19 }
 0x230   :  { %v838_v24 = vsel %vm774_vm2, %v704_v17, %v806_v21  ;;  %v3784_v21 = vld [vmem:[#allocation5 + $0xc0] sm:$0xff]  }
 0x231   :  { %v3398_v25 = vpop.f32.mrb[20].mxu1  ;;  %v836_v27 = vsel %vm772_vm3, %v696_v20, %v804_v22  ;;  %v860_v28 = vpack.c.bf16 %v838_v24, %v837_v23  ;;  %v3783_v20 = vld [vmem:[#allocation5 + $0x138] sm:$0xff]  }
 0x232   :  { %v717_v29 = vadd.f32 %v3398_v25, %v4159_v1  ;;  %v708_v30 = vpop.f32.mrb[21].mxu1  ;;  %v859_v31 = vpack.c.bf16 %v836_v27, %v835_v26  ;;  %3470 = vmatprep.subr.bf16.mxu1 %v3783_v20 }
 0x233   :  { %v709_v32 = vadd.f32 %v4159_v1, %v708_v30  ;;  %v3399_v33 = vpop.f32.mrb[22].mxu1  ;;  %3471 = vmatpush3.bf16.msra.mxu1 %v3783_v20 }
 0x234   :  { %v809_v34 = vmul.f32 0.2, %v717_v29  ;;  %v720_v35 = vadd.f32 %v3399_v33, %v4159_v1  ;;  %v711_v36 = vpop.f32.mrb[23].mxu1  ;;  %3440 = vmatprep.mubr.bf16.mxu0 %v859_v31  ;;  %vm777_vm4 = vcmp.gt.f32.partialorder %v717_v29, 0.0  ;;  %3504 = vmatprep.subr.bf16.mxu1 %v3784_v21  ;;  %v3793_v33 = vld [vmem:[#allocation5 + $0x148] sm:$0xff]  }
 0x235   :  { %v807_v37 = vmul.f32 0.2, %v709_v32  ;;  %v712_v38 = vadd.f32 %v4159_v1, %v711_v36  ;;  %3441 = vmatmul.mubr.bf16.gmra.mrb[48].mxu0 %v860_v28  ;;  %vm775_vm5 = vcmp.gt.f32.partialorder %v709_v32, 0.0 }
 0x236   :  { %vm778_vm6 = vcmp.gt.f32.partialorder %v720_v35, 0.0  ;;  %v810_v40 = vmul.f32 0.2, %v720_v35  ;;  %v841_v42 = vsel %vm777_vm4, %v717_v29, %v809_v34 }
 0x237   :  { %vm776_vm7 = vcmp.gt.f32.partialorder %v712_v38, 0.0  ;;  %v808_v41 = vmul.f32 0.2, %v712_v38  ;;  %v839_v45 = vsel %vm775_vm5, %v709_v32, %v807_v37  ;;  %v3792_v32 = vld [vmem:[#allocation5 + $0x140] sm:$0xff]  }
 0x238   :  { %v842_v43 = vsel %vm778_vm6, %v720_v35, %v810_v40  ;;  %3552 = vmatprep.subr.bf16.mxu0 %v3792_v32 }
 0x239   :  { %v3402_v44 = vpop.f32.mrb[24].mxu1  ;;  %v840_v46 = vsel %vm776_vm7, %v712_v38, %v808_v41  ;;  %v862_v47 = vpack.c.bf16 %v842_v43, %v841_v42  ;;  %3553 = vmatpush3.bf16.msra.mxu0 %v3792_v32  ;;  %v3794_v43 = vld [vmem:[#allocation5 + $0x150] sm:$0xff]  }
 0x23a   :  { %v733_v48 = vadd.f32 %v3402_v44, %v4159_v1  ;;  %v724_v49 = vpop.f32.mrb[25].mxu1  ;;  %v861_v50 = vpack.c.bf16 %v840_v46, %v839_v45  ;;  %3554 = vmatprep.subr.bf16.mxu0 %v3793_v33 }
 0x23b   :  { %v725_v51 = vadd.f32 %v4159_v1, %v724_v49  ;;  %v3403_v52 = vpop.f32.mrb[26].mxu1  ;;  %v3785_v49 = vld [vmem:[#allocation5 + $0xc8] sm:$0xff]  }
 0x23c   :  { %v813_v53 = vmul.f32 0.2, %v733_v48  ;;  %v736_v54 = vadd.f32 %v3403_v52, %v4159_v1  ;;  %v727_v55 = vpop.f32.mrb[27].mxu1  ;;  %3444 = vmatprep.mubr.bf16.mxu0 %v861_v50  ;;  %vm781_vm8 = vcmp.gt.f32.partialorder %v733_v48, 0.0 }
 0x23d   :  { %v811_v56 = vmul.f32 0.2, %v725_v51  ;;  %v728_v57 = vadd.f32 %v4159_v1, %v727_v55  ;;  %3445 = vmatmul.mubr.bf16.gmra.mrb[52].mxu0 %v862_v47  ;;  %vm779_vm9 = vcmp.gt.f32.partialorder %v725_v51, 0.0  ;;  %v3795_v55 = vld [vmem:[#allocation5 + $0x158] sm:$0xff]  }
 0x23e   :  { %vm782_vm10 = vcmp.gt.f32.partialorder %v736_v54, 0.0  ;;  %v814_v58 = vmul.f32 0.2, %v736_v54  ;;  %v845_v60 = vsel %vm781_vm8, %v733_v48, %v813_v53  ;;  %3555 = vmatpush3.bf16.msra.mxu0 %v3793_v33 }
 0x23f   :  { %vm780_vm11 = vcmp.gt.f32.partialorder %v728_v57, 0.0  ;;  %v812_v59 = vmul.f32 0.2, %v728_v57  ;;  %v843_v62 = vsel %vm779_vm9, %v725_v51, %v811_v56  ;;  %3556 = vmatprep.subr.bf16.mxu0 %v3794_v43 }
 0x240   :  { %v846_v39 = vsel %vm782_vm10, %v736_v54, %v814_v58  ;;  %v3786_v58 = vld [vmem:[#allocation5 + $0xd0] sm:$0xff]  }
 0x241   :  { %v3406_v61 = vpop.f32.mrb[28].mxu1  ;;  %v844_v63 = vsel %vm780_vm11, %v728_v57, %v812_v59  ;;  %v864_v0 = vpack.c.bf16 %v846_v39, %v845_v60 }
 0x242   :  { %v749_v2 = vadd.f32 %v3406_v61, %v4159_v1  ;;  %v740_v3 = vpop.f32.mrb[29].mxu1  ;;  %v863_v4 = vpack.c.bf16 %v844_v63, %v843_v62  ;;  %3557 = vmatpush3.bf16.msra.mxu0 %v3794_v43 }
 0x243   :  { %v741_v5 = vadd.f32 %v4159_v1, %v740_v3  ;;  %v3407_v6 = vpop.f32.mrb[30].mxu1  ;;  %3558 = vmatprep.subr.bf16.mxu0 %v3795_v55 }
 0x244   :  { %v817_v7 = vmul.f32 0.2, %v749_v2  ;;  %v752_v8 = vadd.f32 %v3407_v6, %v4159_v1  ;;  %v743_v9 = vpop.f32.mrb[31].mxu1  ;;  %3448 = vmatprep.mubr.bf16.mxu0 %v863_v4  ;;  %vm785_vm12 = vcmp.gt.f32.partialorder %v749_v2, 0.0 }
 0x245   :  { %v815_v10 = vmul.f32 0.2, %v741_v5  ;;  %v744_v11 = vadd.f32 %v4159_v1, %v743_v9  ;;  %3449 = vmatmul.mubr.bf16.gmra.mrb[56].mxu0 %v864_v0  ;;  %vm783_vm13 = vcmp.gt.f32.partialorder %v741_v5, 0.0  ;;  %v4193_v1 = vld [vmem:[#allocation7 + $0x2] ss:$0 sm:$0xff] }
 0x246   :  { %vm786_vm14 = vcmp.gt.f32.partialorder %v752_v8, 0.0  ;;  %v818_v12 = vmul.f32 0.2, %v752_v8  ;;  %v849_v14 = vsel %vm785_vm12, %v749_v2, %v817_v7  ;;  %v3796_v0 = vld [vmem:[#allocation5 + $0x160] sm:$0xff]   ;;  %v3787_v7 = vld [vmem:[#allocation5 + $0xd8] sm:$0xff]   ;;  %3559 = vmatpush3.bf16.msra.mxu0 %v3795_v55 }
 0x247   :  { %vm784_vm15 = vcmp.gt.f32.partialorder %v744_v11, 0.0  ;;  %v816_v13 = vmul.f32 0.2, %v744_v11  ;;  %v847_v16 = vsel %vm783_vm13, %v741_v5, %v815_v10  ;;  %3560 = vmatprep.subr.bf16.mxu0 %v3796_v0 }
 0x248   :  { %v850_v15 = vsel %vm786_vm14, %v752_v8, %v818_v12 }
 0x249   :  { %v848_v17 = vsel %vm784_vm15, %v744_v11, %v816_v13  ;;  %v866_v18 = vpack.c.bf16 %v850_v15, %v849_v14  ;;  %v3797_v13 = vld [vmem:[#allocation5 + $0x168] sm:$0xff]  }
 0x24a   :  { %v865_v19 = vpack.c.bf16 %v848_v17, %v847_v16  ;;  %v3788_v16 = vld [vmem:[#allocation5 + $0xe0] sm:$0xff]   ;;  %3561 = vmatpush3.bf16.msra.mxu0 %v3796_v0 }
 0x24b   :  { %3562 = vmatprep.subr.bf16.mxu0 %v3797_v13 }
 0x24c   :  { %3452 = vmatprep.mubr.bf16.mxu0 %v865_v19 }
 0x24d   :  { %3453 = vmatmul.mubr.bf16.gmra.mrb[60].mxu0 %v866_v18 }
 0x24e   :  { %3563 = vmatpush3.bf16.msra.mxu0 %v3797_v13 }
 0x2e8   :  { %v3426_v22 = vpop.f32.mrb[32].mxu0 }
 0x2e9   :  { %v979_v23 = vadd.f32 %v3426_v22, %v4193_v1  ;;  %v970_v24 = vpop.f32.mrb[33].mxu0 }
 0x2ea   :  { %v971_v25 = vadd.f32 %v4193_v1, %v970_v24  ;;  %v3427_v26 = vpop.f32.mrb[34].mxu0 }
 0x2eb   :  { %v1131_v27 = vmul.f32 0.2, %v979_v23  ;;  %v982_v28 = vadd.f32 %v3427_v26, %v4193_v1  ;;  %v973_v29 = vpop.f32.mrb[35].mxu0  ;;  %vm1099_vm0 = vcmp.gt.f32.partialorder %v979_v23, 0.0 }
 0x2ec   :  { %v1129_v30 = vmul.f32 0.2, %v971_v25  ;;  %v974_v31 = vadd.f32 %v4193_v1, %v973_v29  ;;  %vm1097_vm1 = vcmp.gt.f32.partialorder %v971_v25, 0.0  ;;  %v3789_v29 = vld [vmem:[#allocation5 + $0xe8] sm:$0xff]  }
 0x2ed   :  { %vm1100_vm2 = vcmp.gt.f32.partialorder %v982_v28, 0.0  ;;  %v1132_v34 = vmul.f32 0.2, %v982_v28  ;;  %v1163_v36 = vsel %vm1099_vm0, %v979_v23, %v1131_v27  ;;  %v3798_v23 = vld [vmem:[#allocation5 + $0x170] sm:$0xff]  }
 0x2ee   :  { %vm1098_vm3 = vcmp.gt.f32.partialorder %v974_v31, 0.0  ;;  %v1130_v35 = vmul.f32 0.2, %v974_v31  ;;  %v1161_v41 = vsel %vm1097_vm1, %v971_v25, %v1129_v30  ;;  %3564 = vmatprep.subr.bf16.mxu0 %v3798_v23 }
 0x2ef   :  { %v1164_v37 = vsel %vm1100_vm2, %v982_v28, %v1132_v34  ;;  %3565 = vmatpush3.bf16.msra.mxu0 %v3798_v23 }
 0x2f0   :  { %v1194_v38 = vpack.c.bf16 %v1164_v37, %v1163_v36  ;;  %v3430_v40 = vpop.f32.mrb[36].mxu0  ;;  %v1162_v42 = vsel %vm1098_vm3, %v974_v31, %v1130_v35  ;;  %v3790_v37 = vld [vmem:[#allocation5 + $0xf0] sm:$0xff]  }
 0x2f1   :  { %v995_v44 = vadd.f32 %v3430_v40, %v4193_v1  ;;  %v986_v45 = vpop.f32.mrb[37].mxu0  ;;  %v1193_v46 = vpack.c.bf16 %v1162_v42, %v1161_v41 }
 0x2f2   :  { %v987_v47 = vadd.f32 %v4193_v1, %v986_v45  ;;  %v3431_v48 = vpop.f32.mrb[38].mxu0 }
 0x2f3   :  { %v1135_v50 = vmul.f32 0.2, %v995_v44  ;;  %v998_v51 = vadd.f32 %v3431_v48, %v4193_v1  ;;  %v989_v52 = vpop.f32.mrb[39].mxu0  ;;  %3472 = vmatprep.mubr.bf16.mxu1 %v1193_v46  ;;  %vm1103_vm4 = vcmp.gt.f32.partialorder %v995_v44, 0.0 }
 0x2f4   :  { %v1133_v53 = vmul.f32 0.2, %v987_v47  ;;  %v990_v54 = vadd.f32 %v4193_v1, %v989_v52  ;;  %3473 = vmatmul.mubr.bf16.vlgmr.msra.gmra.mrb[32].mxu1 %v1194_v38  ;;  %vm1101_vm5 = vcmp.gt.f32.partialorder %v987_v47, 0.0 }
 0x2f5   :  { %vm1104_vm6 = vcmp.gt.f32.partialorder %v998_v51, 0.0  ;;  %v1136_v56 = vmul.f32 0.2, %v998_v51  ;;  %3505 = vmatpush3.bf16.msra.mxu1 %v3784_v21  ;;  %v1167_v59 = vsel %vm1103_vm4, %v995_v44, %v1135_v50  ;;  %v3791_v50 = vld [vmem:[#allocation5 + $0xf8] sm:$0xff]  }
 0x2f6   :  { %vm1102_vm7 = vcmp.gt.f32.partialorder %v990_v54, 0.0  ;;  %v1134_v57 = vmul.f32 0.2, %v990_v54  ;;  %3506 = vmatprep.subr.bf16.mxu1 %v3785_v49  ;;  %v1165_v61 = vsel %vm1101_vm5, %v987_v47, %v1133_v53 }
 0x2f7   :  { %v1168_v60 = vsel %vm1104_vm6, %v998_v51, %v1136_v56 }
 0x2f8   :  { %v3434_v39 = vpop.f32.mrb[40].mxu0  ;;  %v1166_v62 = vsel %vm1102_vm7, %v990_v54, %v1134_v57  ;;  %v1196_v63 = vpack.c.bf16 %v1168_v60, %v1167_v59 }
 0x2f9   :  { %v1011_v2 = vadd.f32 %v3434_v39, %v4193_v1  ;;  %v1002_v3 = vpop.f32.mrb[41].mxu0  ;;  %v1195_v4 = vpack.c.bf16 %v1166_v62, %v1165_v61  ;;  %3507 = vmatpush3.bf16.msra.mxu1 %v3785_v49 }
 0x2fa   :  { %v1003_v5 = vadd.f32 %v4193_v1, %v1002_v3  ;;  %v3435_v6 = vpop.f32.mrb[42].mxu0  ;;  %3508 = vmatprep.subr.bf16.mxu1 %v3786_v58 }
 0x2fb   :  { %v1139_v8 = vmul.f32 0.2, %v1011_v2  ;;  %v1014_v9 = vadd.f32 %v3435_v6, %v4193_v1  ;;  %v1005_v10 = vpop.f32.mrb[43].mxu0  ;;  %3476 = vmatprep.mubr.bf16.mxu1 %v1195_v4  ;;  %vm1107_vm8 = vcmp.gt.f32.partialorder %v1011_v2, 0.0 }
 0x2fc   :  { %v1137_v11 = vmul.f32 0.2, %v1003_v5  ;;  %v1006_v12 = vadd.f32 %v4193_v1, %v1005_v10  ;;  %3477 = vmatmul.mubr.bf16.gmra.mrb[36].mxu1 %v1196_v63  ;;  %vm1105_vm9 = vcmp.gt.f32.partialorder %v1003_v5, 0.0 }
 0x2fd   :  { %vm1108_vm10 = vcmp.gt.f32.partialorder %v1014_v9, 0.0  ;;  %v1140_v14 = vmul.f32 0.2, %v1014_v9  ;;  %3509 = vmatpush3.bf16.msra.mxu1 %v3786_v58  ;;  %v1171_v17 = vsel %vm1107_vm8, %v1011_v2, %v1139_v8 }
 0x2fe   :  { %vm1106_vm11 = vcmp.gt.f32.partialorder %v1006_v12, 0.0  ;;  %v1138_v15 = vmul.f32 0.2, %v1006_v12  ;;  %3510 = vmatprep.subr.bf16.mxu1 %v3787_v7  ;;  %v1169_v20 = vsel %vm1105_vm9, %v1003_v5, %v1137_v11 }
 0x2ff   :  { %v1172_v18 = vsel %vm1108_vm10, %v1014_v9, %v1140_v14 }
 0x300   :  { %v3438_v19 = vpop.f32.mrb[44].mxu0  ;;  %v1170_v21 = vsel %vm1106_vm11, %v1006_v12, %v1138_v15  ;;  %v1198_v22 = vpack.c.bf16 %v1172_v18, %v1171_v17 }
 0x301   :  { %v1027_v24 = vadd.f32 %v3438_v19, %v4193_v1  ;;  %v1018_v25 = vpop.f32.mrb[45].mxu0  ;;  %v1197_v26 = vpack.c.bf16 %v1170_v21, %v1169_v20  ;;  %3511 = vmatpush3.bf16.msra.mxu1 %v3787_v7 }
 0x302   :  { %v1019_v27 = vadd.f32 %v4193_v1, %v1018_v25  ;;  %v3439_v28 = vpop.f32.mrb[46].mxu0  ;;  %3512 = vmatprep.subr.bf16.mxu1 %v3788_v16 }
 0x303   :  { %v1143_v30 = vmul.f32 0.2, %v1027_v24  ;;  %v1030_v31 = vadd.f32 %v3439_v28, %v4193_v1  ;;  %v1021_v32 = vpop.f32.mrb[47].mxu0  ;;  %3480 = vmatprep.mubr.bf16.mxu1 %v1197_v26  ;;  %vm1111_vm12 = vcmp.gt.f32.partialorder %v1027_v24, 0.0 }
 0x304   :  { %v1141_v33 = vmul.f32 0.2, %v1019_v27  ;;  %v1022_v34 = vadd.f32 %v4193_v1, %v1021_v32  ;;  %3481 = vmatmul.mubr.bf16.gmra.mrb[40].mxu1 %v1198_v22  ;;  %vm1109_vm13 = vcmp.gt.f32.partialorder %v1019_v27, 0.0 }
 0x305   :  { %vm1112_vm14 = vcmp.gt.f32.partialorder %v1030_v31, 0.0  ;;  %v1144_v35 = vmul.f32 0.2, %v1030_v31  ;;  %3513 = vmatpush3.bf16.msra.mxu1 %v3788_v16  ;;  %v1175_v38 = vsel %vm1111_vm12, %v1027_v24, %v1143_v30 }
 0x306   :  { %vm1110_vm15 = vcmp.gt.f32.partialorder %v1022_v34, 0.0  ;;  %v1142_v36 = vmul.f32 0.2, %v1022_v34  ;;  %3514 = vmatprep.subr.bf16.mxu1 %v3789_v29  ;;  %v1173_v42 = vsel %vm1109_vm13, %v1019_v27, %v1141_v33 }
 0x307   :  { %v1176_v40 = vsel %vm1112_vm14, %v1030_v31, %v1144_v35 }
 0x308   :  { %v3442_v41 = vpop.f32.mrb[48].mxu0  ;;  %v1174_v43 = vsel %vm1110_vm15, %v1022_v34, %v1142_v36  ;;  %v1200_v44 = vpack.c.bf16 %v1176_v40, %v1175_v38 }
 0x309   :  { %v1043_v45 = vadd.f32 %v3442_v41, %v4193_v1  ;;  %v1034_v46 = vpop.f32.mrb[49].mxu0  ;;  %v1199_v47 = vpack.c.bf16 %v1174_v43, %v1173_v42  ;;  %3515 = vmatpush3.bf16.msra.mxu1 %v3789_v29 }
 0x30a   :  { %v1035_v48 = vadd.f32 %v4193_v1, %v1034_v46  ;;  %v3443_v49 = vpop.f32.mrb[50].mxu0  ;;  %3516 = vmatprep.subr.bf16.mxu1 %v3790_v37 }
 0x30b   :  { %v1147_v51 = vmul.f32 0.2, %v1043_v45  ;;  %v1046_v52 = vadd.f32 %v3443_v49, %v4193_v1  ;;  %v1037_v53 = vpop.f32.mrb[51].mxu0  ;;  %3484 = vmatprep.mubr.bf16.mxu1 %v1199_v47  ;;  %vm1115_vm0 = vcmp.gt.f32.partialorder %v1043_v45, 0.0 }
 0x30c   :  { %v1145_v54 = vmul.f32 0.2, %v1035_v48  ;;  %v1038_v55 = vadd.f32 %v4193_v1, %v1037_v53  ;;  %3485 = vmatmul.mubr.bf16.gmra.mrb[44].mxu1 %v1200_v44  ;;  %vm1113_vm1 = vcmp.gt.f32.partialorder %v1035_v48, 0.0 }
 0x30d   :  { %vm1116_vm2 = vcmp.gt.f32.partialorder %v1046_v52, 0.0  ;;  %v1148_v56 = vmul.f32 0.2, %v1046_v52  ;;  %3517 = vmatpush3.bf16.msra.mxu1 %v3790_v37  ;;  %v1179_v58 = vsel %vm1115_vm0, %v1043_v45, %v1147_v51 }
 0x30e   :  { %vm1114_vm3 = vcmp.gt.f32.partialorder %v1038_v55, 0.0  ;;  %v1146_v57 = vmul.f32 0.2, %v1038_v55  ;;  %3518 = vmatprep.subr.bf16.mxu1 %v3791_v50  ;;  %v1177_v39 = vsel %vm1113_vm1, %v1035_v48, %v1145_v54 }
 0x30f   :  { %v1180_v59 = vsel %vm1116_vm2, %v1046_v52, %v1148_v56  ;;  %v3945_v56 = vld [vmem:[#allocation2 + $0x8] sm:$0xff]  }
 0x310   :  { %v3446_v60 = vpop.f32.mrb[52].mxu0  ;;  %v1178_v61 = vsel %vm1114_vm3, %v1038_v55, %v1146_v57  ;;  %v1202_v62 = vpack.c.bf16 %v1180_v59, %v1179_v58  ;;  %v3944_v55 = vld [vmem:[#allocation2] sm:$0xff]   ;;  %v3946_v57 = vld [vmem:[#allocation2 + $0x10] sm:$0xff]   ;;  %v3949_v59 = vld [vmem:[#allocation2 + $0x28] sm:$0xff]  }
 0x311   :  { %v1059_v63 = vadd.f32 %v3446_v60, %v4193_v1  ;;  %v1050_v0 = vpop.f32.mrb[53].mxu0  ;;  %v1201_v2 = vpack.c.bf16 %v1178_v61, %v1177_v39  ;;  %3519 = vmatpush3.bf16.msra.mxu1 %v3791_v50  ;;  %v3948_v58 = vld [vmem:[#allocation2 + $0x20] sm:$0xff]   ;;  %v3950_v60 = vld [vmem:[#allocation2 + $0x30] sm:$0xff]   ;;  %v3951_v39 = vld [vmem:[#allocation2 + $0x38] sm:$0xff]  }
 0x312   :  { %v1051_v3 = vadd.f32 %v4193_v1, %v1050_v0  ;;  %v3447_v4 = vpop.f32.mrb[54].mxu0  ;;  %v3952_v61 = vld [vmem:[#allocation2 + $0x40] sm:$0xff]   ;;  %v3955_v0 = vld [vmem:[#allocation2 + $0x58] sm:$0xff]  }
 0x313   :  { %v1151_v5 = vmul.f32 0.2, %v1059_v63  ;;  %v1062_v6 = vadd.f32 %v3447_v4, %v4193_v1  ;;  %v1053_v7 = vpop.f32.mrb[55].mxu0  ;;  %3488 = vmatprep.mubr.bf16.mxu1 %v1201_v2  ;;  %vm1119_vm4 = vcmp.gt.f32.partialorder %v1059_v63, 0.0  ;;  %v3956_v2 = vld [vmem:[#allocation2 + $0x60] sm:$0xff]   ;;  %v3958_v4 = vld [vmem:[#allocation2 + $0x70] sm:$0xff]  }
 0x314   :  { %v1149_v8 = vmul.f32 0.2, %v1051_v3  ;;  %v1054_v9 = vadd.f32 %v4193_v1, %v1053_v7  ;;  %3489 = vmatmul.mubr.bf16.gmra.mrb[48].mxu1 %v1202_v62  ;;  %vm1117_vm5 = vcmp.gt.f32.partialorder %v1051_v3, 0.0  ;;  %v3953_v62 = vld [vmem:[#allocation2 + $0x48] sm:$0xff]   ;;  %v3800_v7 = vld [vmem:[#allocation5 + $0x180] sm:$0xff]  }
 0x315   :  { %vm1120_vm6 = vcmp.gt.f32.partialorder %v1062_v6, 0.0  ;;  %v1152_v10 = vmul.f32 0.2, %v1062_v6  ;;  %v1183_v12 = vsel %vm1119_vm4, %v1059_v63, %v1151_v5  ;;  %v3954_v63 = vld [vmem:[#allocation2 + $0x50] sm:$0xff]   ;;  %v3959_v5 = vld [vmem:[#allocation2 + $0x78] sm:$0xff]  }
 0x316   :  { %vm1118_vm7 = vcmp.gt.f32.partialorder %v1054_v9, 0.0  ;;  %v1150_v11 = vmul.f32 0.2, %v1054_v9  ;;  %v1181_v15 = vsel %vm1117_vm5, %v1051_v3, %v1149_v8  ;;  %v3957_v3 = vld [vmem:[#allocation2 + $0x68] sm:$0xff]   ;;  %v4227_v8 = vld [vmem:[#allocation7 + $0x3] ss:$0 sm:$0xff] }
 0x317   :  { %v1184_v13 = vsel %vm1120_vm6, %v1062_v6, %v1152_v10  ;;  %v3799_v6 = vld [vmem:[#allocation5 + $0x178] sm:$0xff]  }
 0x318   :  { %v3450_v14 = vpop.f32.mrb[56].mxu0  ;;  %v1182_v16 = vsel %vm1118_vm7, %v1054_v9, %v1150_v11  ;;  %v1204_v17 = vpack.c.bf16 %v1184_v13, %v1183_v12  ;;  %3566 = vmatprep.subr.bf16.mxu0 %v3799_v6 }
 0x319   :  { %v1075_v18 = vadd.f32 %v3450_v14, %v4193_v1  ;;  %v1066_v19 = vpop.f32.mrb[57].mxu0  ;;  %v1203_v20 = vpack.c.bf16 %v1182_v16, %v1181_v15  ;;  %3567 = vmatpush3.bf16.msra.mxu0 %v3799_v6 }
 0x31a   :  { %v1067_v21 = vadd.f32 %v4193_v1, %v1066_v19  ;;  %v3451_v22 = vpop.f32.mrb[58].mxu0  ;;  %3600 = vmatprep.subr.bf16.mxu0 %v3800_v7 }
 0x31b   :  { %v1155_v23 = vmul.f32 0.2, %v1075_v18  ;;  %v1078_v24 = vadd.f32 %v3451_v22, %v4193_v1  ;;  %v1069_v25 = vpop.f32.mrb[59].mxu0  ;;  %3492 = vmatprep.mubr.bf16.mxu1 %v1203_v20  ;;  %vm1123_vm8 = vcmp.gt.f32.partialorder %v1075_v18, 0.0 }
 0x31c   :  { %v1153_v26 = vmul.f32 0.2, %v1067_v21  ;;  %v1070_v27 = vadd.f32 %v4193_v1, %v1069_v25  ;;  %3493 = vmatmul.mubr.bf16.gmra.mrb[52].mxu1 %v1204_v17  ;;  %vm1121_vm9 = vcmp.gt.f32.partialorder %v1067_v21, 0.0 }
 0x31d   :  { %vm1124_vm10 = vcmp.gt.f32.partialorder %v1078_v24, 0.0  ;;  %v1156_v28 = vmul.f32 0.2, %v1078_v24  ;;  %v1187_v30 = vsel %vm1123_vm8, %v1075_v18, %v1155_v23 }
 0x31e   :  { %vm1122_vm11 = vcmp.gt.f32.partialorder %v1070_v27, 0.0  ;;  %v1154_v29 = vmul.f32 0.2, %v1070_v27  ;;  %v1185_v33 = vsel %vm1121_vm9, %v1067_v21, %v1153_v26 }
 0x31f   :  { %v1188_v31 = vsel %vm1124_vm10, %v1078_v24, %v1156_v28 }
 0x320   :  { %v3454_v32 = vpop.f32.mrb[60].mxu0  ;;  %v1186_v34 = vsel %vm1122_vm11, %v1070_v27, %v1154_v29  ;;  %v1206_v35 = vpack.c.bf16 %v1188_v31, %v1187_v30 }
 0x321   :  { %v1091_v36 = vadd.f32 %v3454_v32, %v4193_v1  ;;  %v1082_v37 = vpop.f32.mrb[61].mxu0  ;;  %v1205_v38 = vpack.c.bf16 %v1186_v34, %v1185_v33  ;;  %v3801_v32 = vld [vmem:[#allocation5 + $0x188] sm:$0xff]  }
 0x322   :  { %v1083_v40 = vadd.f32 %v4193_v1, %v1082_v37  ;;  %v3455_v41 = vpop.f32.mrb[62].mxu0 }
 0x323   :  { %v1159_v42 = vmul.f32 0.2, %v1091_v36  ;;  %v1094_v43 = vadd.f32 %v3455_v41, %v4193_v1  ;;  %v1085_v44 = vpop.f32.mrb[63].mxu0  ;;  %3496 = vmatprep.mubr.bf16.mxu1 %v1205_v38  ;;  %vm1127_vm12 = vcmp.gt.f32.partialorder %v1091_v36, 0.0  ;;  %v3802_v41 = vld [vmem:[#allocation5 + $0x190] sm:$0xff]  }
 0x324   :  { %v1157_v45 = vmul.f32 0.2, %v1083_v40  ;;  %v1086_v46 = vadd.f32 %v4193_v1, %v1085_v44  ;;  %3497 = vmatmul.mubr.bf16.gmra.mrb[56].mxu1 %v1206_v35  ;;  %vm1125_vm13 = vcmp.gt.f32.partialorder %v1083_v40, 0.0  ;;  %v3947_v1 = vld [vmem:[#allocation2 + $0x18] sm:$0xff]  }
 0x325   :  { %vm1128_vm14 = vcmp.gt.f32.partialorder %v1094_v43, 0.0  ;;  %v1160_v47 = vmul.f32 0.2, %v1094_v43  ;;  %v1191_v49 = vsel %vm1127_vm12, %v1091_v36, %v1159_v42 }
 0x326   :  { %vm1126_vm15 = vcmp.gt.f32.partialorder %v1086_v46, 0.0  ;;  %v1158_v48 = vmul.f32 0.2, %v1086_v46  ;;  %v1189_v51 = vsel %vm1125_vm13, %v1083_v40, %v1157_v45 }
 0x327   :  { %v1192_v50 = vsel %vm1128_vm14, %v1094_v43, %v1160_v47 }
 0x328   :  { %v1190_v52 = vsel %vm1126_vm15, %v1086_v46, %v1158_v48  ;;  %v1208_v53 = vpack.c.bf16 %v1192_v50, %v1191_v49 }
 0x329   :  { %v1207_v54 = vpack.c.bf16 %v1190_v52, %v1189_v51 }
 0x32b   :  { %3500 = vmatprep.mubr.bf16.mxu1 %v1207_v54 }
 0x32c   :  { %3501 = vmatmul.mubr.bf16.gmra.mrb[60].mxu1 %v1208_v53  ;;  %v3803_v53 = vld [vmem:[#allocation5 + $0x198] sm:$0xff]  }
 0x32d   :  { %3520 = vmatprep.mubr.bf16.mxu1 %v3944_v55 }
 0x334   :  { %3521 = vmatmul.mubr.bf16.vlgmr.msra.gmra.mrb[32].mxu1 %v3945_v56 }
 0x335   :  { %3524 = vmatprep.mubr.bf16.mxu1 %v3946_v57 }
 0x33c   :  { %3525 = vmatmul.mubr.bf16.gmra.mrb[36].mxu1 %v3947_v1 }
 0x33d   :  { %3528 = vmatprep.mubr.bf16.mxu1 %v3948_v58 }
 0x344   :  { %3529 = vmatmul.mubr.bf16.gmra.mrb[40].mxu1 %v3949_v59 }
 0x345   :  { %3532 = vmatprep.mubr.bf16.mxu1 %v3950_v60  ;;  %v3804_v60 = vld [vmem:[#allocation5 + $0x1a0] sm:$0xff]  }
 0x34c   :  { %3533 = vmatmul.mubr.bf16.gmra.mrb[44].mxu1 %v3951_v39 }
 0x34d   :  { %3536 = vmatprep.mubr.bf16.mxu1 %v3952_v61 }
 0x354   :  { %3537 = vmatmul.mubr.bf16.gmra.mrb[48].mxu1 %v3953_v62 }
 0x355   :  { %3540 = vmatprep.mubr.bf16.mxu1 %v3954_v63 }
 0x35c   :  { %3541 = vmatmul.mubr.bf16.gmra.mrb[52].mxu1 %v3955_v0 }
 0x35d   :  { %3544 = vmatprep.mubr.bf16.mxu1 %v3956_v2 }
 0x364   :  { %3545 = vmatmul.mubr.bf16.gmra.mrb[56].mxu1 %v3957_v3 }
 0x365   :  { %3548 = vmatprep.mubr.bf16.mxu1 %v3958_v4 }
 0x36c   :  { %3549 = vmatmul.mubr.bf16.gmra.mrb[60].mxu1 %v3959_v5 }
 0x407   :  { %v3522_v9 = vpop.f32.mrb[32].mxu1 }
 0x408   :  { %v1666_v10 = vadd.f32 %v3522_v9, %v4227_v8  ;;  %v1532_v11 = vpop.f32.mrb[33].mxu1  ;;  %v3805_v9 = vld [vmem:[#allocation5 + $0x1a8] sm:$0xff]  }
 0x409   :  { %v1664_v12 = vadd.f32 %v4227_v8, %v1532_v11  ;;  %v3523_v13 = vpop.f32.mrb[34].mxu1 }
 0x40a   :  { %v1730_v14 = vmul.f32 0.2, %v1666_v10  ;;  %v1667_v15 = vadd.f32 %v3523_v13, %v4227_v8  ;;  %v1535_v16 = vpop.f32.mrb[35].mxu1  ;;  %vm1698_vm0 = vcmp.gt.f32.partialorder %v1666_v10, 0.0 }
 0x40b   :  { %v1728_v17 = vmul.f32 0.2, %v1664_v12  ;;  %v1665_v18 = vadd.f32 %v4227_v8, %v1535_v16  ;;  %vm1696_vm1 = vcmp.gt.f32.partialorder %v1664_v12, 0.0 }
 0x40c   :  { %vm1699_vm2 = vcmp.gt.f32.partialorder %v1667_v15, 0.0  ;;  %v1731_v19 = vmul.f32 0.2, %v1667_v15  ;;  %v1762_v21 = vsel %vm1698_vm0, %v1666_v10, %v1730_v14 }
 0x40d   :  { %vm1697_vm3 = vcmp.gt.f32.partialorder %v1665_v18, 0.0  ;;  %v1729_v20 = vmul.f32 0.2, %v1665_v18  ;;  %v1760_v25 = vsel %vm1696_vm1, %v1664_v12, %v1728_v17  ;;  %v3806_v17 = vld [vmem:[#allocation5 + $0x1b0] sm:$0xff]  }
 0x40e   :  { %v1763_v22 = vsel %vm1699_vm2, %v1667_v15, %v1731_v19 }
 0x40f   :  { %v1793_v23 = vpack.c.bf16 %v1763_v22, %v1762_v21  ;;  %v3526_v24 = vpop.f32.mrb[36].mxu1  ;;  %v1761_v26 = vsel %vm1697_vm3, %v1665_v18, %v1729_v20 }
 0x410   :  { %v1670_v27 = vadd.f32 %v3526_v24, %v4227_v8  ;;  %v1548_v28 = vpop.f32.mrb[37].mxu1  ;;  %v1792_v29 = vpack.c.bf16 %v1761_v26, %v1760_v25 }
 0x411   :  { %v1668_v30 = vadd.f32 %v4227_v8, %v1548_v28  ;;  %v3527_v31 = vpop.f32.mrb[38].mxu1 }
 0x412   :  { %v1734_v33 = vmul.f32 0.2, %v1670_v27  ;;  %v1671_v34 = vadd.f32 %v3527_v31, %v4227_v8  ;;  %v1551_v35 = vpop.f32.mrb[39].mxu1  ;;  %3568 = vmatprep.mubr.bf16.mxu0 %v1792_v29  ;;  %vm1702_vm4 = vcmp.gt.f32.partialorder %v1670_v27, 0.0 }
 0x413   :  { %v1732_v36 = vmul.f32 0.2, %v1668_v30  ;;  %v1669_v37 = vadd.f32 %v4227_v8, %v1551_v35  ;;  %3569 = vmatmul.mubr.bf16.vlgmr.msra.gmra.mrb[64].mxu0 %v1793_v23  ;;  %vm1700_vm5 = vcmp.gt.f32.partialorder %v1668_v30, 0.0 }
 0x414   :  { %vm1703_vm6 = vcmp.gt.f32.partialorder %v1671_v34, 0.0  ;;  %v1735_v38 = vmul.f32 0.2, %v1671_v34  ;;  %3601 = vmatpush3.bf16.msra.mxu0 %v3800_v7  ;;  %v1766_v42 = vsel %vm1702_vm4, %v1670_v27, %v1734_v33 }
 0x415   :  { %vm1701_vm7 = vcmp.gt.f32.partialorder %v1669_v37, 0.0  ;;  %v1733_v40 = vmul.f32 0.2, %v1669_v37  ;;  %3602 = vmatprep.subr.bf16.mxu0 %v3801_v32  ;;  %v1764_v45 = vsel %vm1700_vm5, %v1668_v30, %v1732_v36 }
 0x416   :  { %v1767_v43 = vsel %vm1703_vm6, %v1671_v34, %v1735_v38 }
 0x417   :  { %v3530_v44 = vpop.f32.mrb[40].mxu1  ;;  %v1765_v46 = vsel %vm1701_vm7, %v1669_v37, %v1733_v40  ;;  %v1795_v47 = vpack.c.bf16 %v1767_v43, %v1766_v42 }
 0x418   :  { %v1674_v48 = vadd.f32 %v3530_v44, %v4227_v8  ;;  %v1564_v49 = vpop.f32.mrb[41].mxu1  ;;  %v1794_v50 = vpack.c.bf16 %v1765_v46, %v1764_v45  ;;  %3603 = vmatpush3.bf16.msra.mxu0 %v3801_v32 }
 0x419   :  { %v1672_v51 = vadd.f32 %v4227_v8, %v1564_v49  ;;  %v3531_v52 = vpop.f32.mrb[42].mxu1  ;;  %3604 = vmatprep.subr.bf16.mxu0 %v3802_v41 }
 0x41a   :  { %v1738_v54 = vmul.f32 0.2, %v1674_v48  ;;  %v1675_v55 = vadd.f32 %v3531_v52, %v4227_v8  ;;  %v1567_v56 = vpop.f32.mrb[43].mxu1  ;;  %3572 = vmatprep.mubr.bf16.mxu0 %v1794_v50  ;;  %vm1706_vm8 = vcmp.gt.f32.partialorder %v1674_v48, 0.0 }
 0x41b   :  { %v1736_v57 = vmul.f32 0.2, %v1672_v51  ;;  %v1673_v1 = vadd.f32 %v4227_v8, %v1567_v56  ;;  %3573 = vmatmul.mubr.bf16.gmra.mrb[68].mxu0 %v1795_v47  ;;  %vm1704_vm9 = vcmp.gt.f32.partialorder %v1672_v51, 0.0 }
 0x41c   :  { %vm1707_vm10 = vcmp.gt.f32.partialorder %v1675_v55, 0.0  ;;  %v1739_v58 = vmul.f32 0.2, %v1675_v55  ;;  %3605 = vmatpush3.bf16.msra.mxu0 %v3802_v41  ;;  %v1770_v39 = vsel %vm1706_vm8, %v1674_v48, %v1738_v54 }
 0x41d   :  { %vm1705_vm11 = vcmp.gt.f32.partialorder %v1673_v1, 0.0  ;;  %v1737_v59 = vmul.f32 0.2, %v1673_v1  ;;  %3606 = vmatprep.subr.bf16.mxu0 %v3803_v53  ;;  %v1768_v63 = vsel %vm1704_vm9, %v1672_v51, %v1736_v57 }
 0x41e   :  { %v1771_v61 = vsel %vm1707_vm10, %v1675_v55, %v1739_v58 }
 0x41f   :  { %v3534_v62 = vpop.f32.mrb[44].mxu1  ;;  %v1769_v0 = vsel %vm1705_vm11, %v1673_v1, %v1737_v59  ;;  %v1797_v2 = vpack.c.bf16 %v1771_v61, %v1770_v39 }
 0x420   :  { %v1678_v3 = vadd.f32 %v3534_v62, %v4227_v8  ;;  %v1580_v4 = vpop.f32.mrb[45].mxu1  ;;  %v1796_v5 = vpack.c.bf16 %v1769_v0, %v1768_v63  ;;  %3607 = vmatpush3.bf16.msra.mxu0 %v3803_v53 }
 0x421   :  { %v1676_v6 = vadd.f32 %v4227_v8, %v1580_v4  ;;  %v3535_v7 = vpop.f32.mrb[46].mxu1  ;;  %3608 = vmatprep.subr.bf16.mxu0 %v3804_v60 }
 0x422   :  { %v1742_v10 = vmul.f32 0.2, %v1678_v3  ;;  %v1679_v11 = vadd.f32 %v3535_v7, %v4227_v8  ;;  %v1583_v12 = vpop.f32.mrb[47].mxu1  ;;  %3576 = vmatprep.mubr.bf16.mxu0 %v1796_v5  ;;  %vm1710_vm12 = vcmp.gt.f32.partialorder %v1678_v3, 0.0 }
 0x423   :  { %v1740_v13 = vmul.f32 0.2, %v1676_v6  ;;  %v1677_v14 = vadd.f32 %v4227_v8, %v1583_v12  ;;  %3577 = vmatmul.mubr.bf16.gmra.mrb[72].mxu0 %v1797_v2  ;;  %vm1708_vm13 = vcmp.gt.f32.partialorder %v1676_v6, 0.0 }
 0x424   :  { %vm1711_vm14 = vcmp.gt.f32.partialorder %v1679_v11, 0.0  ;;  %v1743_v15 = vmul.f32 0.2, %v1679_v11  ;;  %3609 = vmatpush3.bf16.msra.mxu0 %v3804_v60  ;;  %v1774_v18 = vsel %vm1710_vm12, %v1678_v3, %v1742_v10 }
 0x425   :  { %vm1709_vm15 = vcmp.gt.f32.partialorder %v1677_v14, 0.0  ;;  %v1741_v16 = vmul.f32 0.2, %v1677_v14  ;;  %3610 = vmatprep.subr.bf16.mxu0 %v3805_v9  ;;  %v1772_v21 = vsel %vm1708_vm13, %v1676_v6, %v1740_v13 }
 0x426   :  { %v1775_v19 = vsel %vm1711_vm14, %v1679_v11, %v1743_v15 }
 0x427   :  { %v3538_v20 = vpop.f32.mrb[48].mxu1  ;;  %v1773_v22 = vsel %vm1709_vm15, %v1677_v14, %v1741_v16  ;;  %v1799_v23 = vpack.c.bf16 %v1775_v19, %v1774_v18 }
 0x428   :  { %v1682_v24 = vadd.f32 %v3538_v20, %v4227_v8  ;;  %v1596_v25 = vpop.f32.mrb[49].mxu1  ;;  %v1798_v26 = vpack.c.bf16 %v1773_v22, %v1772_v21  ;;  %3611 = vmatpush3.bf16.msra.mxu0 %v3805_v9 }
 0x429   :  { %v1680_v27 = vadd.f32 %v4227_v8, %v1596_v25  ;;  %v3539_v28 = vpop.f32.mrb[50].mxu1  ;;  %3612 = vmatprep.subr.bf16.mxu0 %v3806_v17 }
 0x42a   :  { %v1746_v29 = vmul.f32 0.2, %v1682_v24  ;;  %v1683_v30 = vadd.f32 %v3539_v28, %v4227_v8  ;;  %v1599_v31 = vpop.f32.mrb[51].mxu1  ;;  %3580 = vmatprep.mubr.bf16.mxu0 %v1798_v26  ;;  %vm1714_vm0 = vcmp.gt.f32.partialorder %v1682_v24, 0.0 }
 0x42b   :  { %v1744_v32 = vmul.f32 0.2, %v1680_v27  ;;  %v1681_v33 = vadd.f32 %v4227_v8, %v1599_v31  ;;  %3581 = vmatmul.mubr.bf16.gmra.mrb[76].mxu0 %v1799_v23  ;;  %vm1712_vm1 = vcmp.gt.f32.partialorder %v1680_v27, 0.0 }
 0x42c   :  { %vm1715_vm2 = vcmp.gt.f32.partialorder %v1683_v30, 0.0  ;;  %v1747_v34 = vmul.f32 0.2, %v1683_v30  ;;  %3613 = vmatpush3.bf16.msra.mxu0 %v3806_v17  ;;  %v1778_v36 = vsel %vm1714_vm0, %v1682_v24, %v1746_v29 }
 0x42d   :  { %vm1713_vm3 = vcmp.gt.f32.partialorder %v1681_v33, 0.0  ;;  %v1745_v35 = vmul.f32 0.2, %v1681_v33  ;;  %v1776_v40 = vsel %vm1712_vm1, %v1680_v27, %v1744_v32 }
 0x42e   :  { %v1779_v37 = vsel %vm1715_vm2, %v1683_v30, %v1747_v34  ;;  %v3808_v34 = vld [vmem:[#allocation5 + $0x1c0] sm:$0xff]  }
 0x42f   :  { %v3542_v38 = vpop.f32.mrb[52].mxu1  ;;  %v1777_v41 = vsel %vm1713_vm3, %v1681_v33, %v1745_v35  ;;  %v1801_v42 = vpack.c.bf16 %v1779_v37, %v1778_v36  ;;  %v3807_v33 = vld [vmem:[#allocation5 + $0x1b8] sm:$0xff]   ;;  %v3809_v35 = vld [vmem:[#allocation5 + $0x1c8] sm:$0xff]   ;;  %3648 = vmatprep.subr.bf16.mxu1 %v3808_v34  ;;  %v3812_v37 = vld [vmem:[#allocation5 + $0x1e0] sm:$0xff]  }
 0x430   :  { %v1686_v43 = vadd.f32 %v3542_v38, %v4227_v8  ;;  %v1612_v44 = vpop.f32.mrb[53].mxu1  ;;  %v1800_v45 = vpack.c.bf16 %v1777_v41, %v1776_v40  ;;  %3614 = vmatprep.subr.bf16.mxu0 %v3807_v33  ;;  %3649 = vmatpush3.bf16.msra.mxu1 %v3808_v34  ;;  %v3811_v36 = vld [vmem:[#allocation5 + $0x1d8] sm:$0xff]   ;;  %v3813_v38 = vld [vmem:[#allocation5 + $0x1e8] sm:$0xff]   ;;  %v3814_v40 = vld [vmem:[#allocation5 + $0x1f0] sm:$0xff]  }
 0x431   :  { %v1684_v46 = vadd.f32 %v4227_v8, %v1612_v44  ;;  %v3543_v47 = vpop.f32.mrb[54].mxu1  ;;  %3615 = vmatpush3.bf16.msra.mxu0 %v3807_v33  ;;  %3650 = vmatprep.subr.bf16.mxu1 %v3809_v35  ;;  %v4261_v41 = vld [vmem:[#allocation7 + $0x4] ss:$0 sm:$0xff] }
 0x432   :  { %v1750_v48 = vmul.f32 0.2, %v1686_v43  ;;  %v1687_v49 = vadd.f32 %v3543_v47, %v4227_v8  ;;  %v1615_v50 = vpop.f32.mrb[55].mxu1  ;;  %3584 = vmatprep.mubr.bf16.mxu0 %v1800_v45  ;;  %vm1718_vm4 = vcmp.gt.f32.partialorder %v1686_v43, 0.0 }
 0x433   :  { %v1748_v51 = vmul.f32 0.2, %v1684_v46  ;;  %v1685_v52 = vadd.f32 %v4227_v8, %v1615_v50  ;;  %3585 = vmatmul.mubr.bf16.gmra.mrb[80].mxu0 %v1801_v42  ;;  %vm1716_vm5 = vcmp.gt.f32.partialorder %v1684_v46, 0.0 }
 0x434   :  { %vm1719_vm6 = vcmp.gt.f32.partialorder %v1687_v49, 0.0  ;;  %v1751_v53 = vmul.f32 0.2, %v1687_v49  ;;  %v1782_v55 = vsel %vm1718_vm4, %v1686_v43, %v1750_v48  ;;  %3651 = vmatpush3.bf16.msra.mxu1 %v3809_v35 }
 0x435   :  { %vm1717_vm7 = vcmp.gt.f32.partialorder %v1685_v52, 0.0  ;;  %v1749_v54 = vmul.f32 0.2, %v1685_v52  ;;  %v1780_v1 = vsel %vm1716_vm5, %v1684_v46, %v1748_v51 }
 0x436   :  { %v1783_v56 = vsel %vm1719_vm6, %v1687_v49, %v1751_v53 }
 0x437   :  { %v3546_v57 = vpop.f32.mrb[56].mxu1  ;;  %v1781_v58 = vsel %vm1717_vm7, %v1685_v52, %v1749_v54  ;;  %v1803_v59 = vpack.c.bf16 %v1783_v56, %v1782_v55 }
 0x438   :  { %v1690_v60 = vadd.f32 %v3546_v57, %v4227_v8  ;;  %v1628_v39 = vpop.f32.mrb[57].mxu1  ;;  %v1802_v61 = vpack.c.bf16 %v1781_v58, %v1780_v1 }
 0x439   :  { %v1688_v62 = vadd.f32 %v4227_v8, %v1628_v39  ;;  %v3547_v63 = vpop.f32.mrb[58].mxu1 }
 0x43a   :  { %v1754_v0 = vmul.f32 0.2, %v1690_v60  ;;  %v1691_v2 = vadd.f32 %v3547_v63, %v4227_v8  ;;  %v1631_v3 = vpop.f32.mrb[59].mxu1  ;;  %3588 = vmatprep.mubr.bf16.mxu0 %v1802_v61  ;;  %vm1722_vm8 = vcmp.gt.f32.partialorder %v1690_v60, 0.0 }
 0x43b   :  { %v1752_v4 = vmul.f32 0.2, %v1688_v62  ;;  %v1689_v5 = vadd.f32 %v4227_v8, %v1631_v3  ;;  %3589 = vmatmul.mubr.bf16.gmra.mrb[84].mxu0 %v1803_v59  ;;  %vm1720_vm9 = vcmp.gt.f32.partialorder %v1688_v62, 0.0 }
 0x43c   :  { %vm1723_vm10 = vcmp.gt.f32.partialorder %v1691_v2, 0.0  ;;  %v1755_v6 = vmul.f32 0.2, %v1691_v2  ;;  %v1786_v9 = vsel %vm1722_vm8, %v1690_v60, %v1754_v0 }
 0x43d   :  { %vm1721_vm11 = vcmp.gt.f32.partialorder %v1689_v5, 0.0  ;;  %v1753_v7 = vmul.f32 0.2, %v1689_v5  ;;  %v1784_v12 = vsel %vm1720_vm9, %v1688_v62, %v1752_v4 }
 0x43e   :  { %v1787_v10 = vsel %vm1723_vm10, %v1691_v2, %v1755_v6 }
 0x43f   :  { %v3550_v11 = vpop.f32.mrb[60].mxu1  ;;  %v1785_v13 = vsel %vm1721_vm11, %v1689_v5, %v1753_v7  ;;  %v1805_v14 = vpack.c.bf16 %v1787_v10, %v1786_v9 }
 0x440   :  { %v1694_v15 = vadd.f32 %v3550_v11, %v4227_v8  ;;  %v1644_v16 = vpop.f32.mrb[61].mxu1  ;;  %v1804_v17 = vpack.c.bf16 %v1785_v13, %v1784_v12 }
 0x441   :  { %v1692_v18 = vadd.f32 %v4227_v8, %v1644_v16  ;;  %v3551_v19 = vpop.f32.mrb[62].mxu1 }
 0x442   :  { %v1758_v20 = vmul.f32 0.2, %v1694_v15  ;;  %v1695_v21 = vadd.f32 %v3551_v19, %v4227_v8  ;;  %v1647_v22 = vpop.f32.mrb[63].mxu1  ;;  %3592 = vmatprep.mubr.bf16.mxu0 %v1804_v17  ;;  %vm1726_vm12 = vcmp.gt.f32.partialorder %v1694_v15, 0.0 }
 0x443   :  { %v1756_v23 = vmul.f32 0.2, %v1692_v18  ;;  %v1693_v24 = vadd.f32 %v4227_v8, %v1647_v22  ;;  %3593 = vmatmul.mubr.bf16.gmra.mrb[88].mxu0 %v1805_v14  ;;  %vm1724_vm13 = vcmp.gt.f32.partialorder %v1692_v18, 0.0  ;;  %v3810_v8 = vld [vmem:[#allocation5 + $0x1d0] sm:$0xff]  }
 0x444   :  { %vm1727_vm14 = vcmp.gt.f32.partialorder %v1695_v21, 0.0  ;;  %v1759_v25 = vmul.f32 0.2, %v1695_v21  ;;  %v1790_v27 = vsel %vm1726_vm12, %v1694_v15, %v1758_v20  ;;  %3652 = vmatprep.subr.bf16.mxu1 %v3810_v8 }
 0x445   :  { %vm1725_vm15 = vcmp.gt.f32.partialorder %v1693_v24, 0.0  ;;  %v1757_v26 = vmul.f32 0.2, %v1693_v24  ;;  %v1788_v29 = vsel %vm1724_vm13, %v1692_v18, %v1756_v23  ;;  %3653 = vmatpush3.bf16.msra.mxu1 %v3810_v8 }
 0x446   :  { %v1791_v28 = vsel %vm1727_vm14, %v1695_v21, %v1759_v25  ;;  %3654 = vmatprep.subr.bf16.mxu1 %v3811_v36 }
 0x447   :  { %v1789_v30 = vsel %vm1725_vm15, %v1693_v24, %v1757_v26  ;;  %v1807_v31 = vpack.c.bf16 %v1791_v28, %v1790_v27 }
 0x448   :  { %v1806_v32 = vpack.c.bf16 %v1789_v30, %v1788_v29 }
 0x449   :  { %3655 = vmatpush3.bf16.msra.mxu1 %v3811_v36 }
 0x44a   :  { %3596 = vmatprep.mubr.bf16.mxu0 %v1806_v32  ;;  %3656 = vmatprep.subr.bf16.mxu1 %v3812_v37 }
 0x44b   :  { %3597 = vmatmul.mubr.bf16.gmra.mrb[92].mxu0 %v1807_v31 }
 0x44d   :  { %3657 = vmatpush3.bf16.msra.mxu1 %v3812_v37 }
 0x44e   :  { %3658 = vmatprep.subr.bf16.mxu1 %v3813_v38 }
 0x451   :  { %3659 = vmatpush3.bf16.msra.mxu1 %v3813_v38 }
 0x452   :  { %3660 = vmatprep.subr.bf16.mxu1 %v3814_v40 }
 0x455   :  { %3661 = vmatpush3.bf16.msra.mxu1 %v3814_v40 }
 0x4e6   :  { %v3570_v42 = vpop.f32.mrb[64].mxu0 }
 0x4e7   :  { %v1920_v43 = vadd.f32 %v3570_v42, %v4261_v41  ;;  %v1911_v44 = vpop.f32.mrb[65].mxu0 }
 0x4e8   :  { %v1912_v45 = vadd.f32 %v4261_v41, %v1911_v44  ;;  %v3571_v46 = vpop.f32.mrb[66].mxu0 }
 0x4e9   :  { %v2072_v47 = vmul.f32 0.2, %v1920_v43  ;;  %v1923_v48 = vadd.f32 %v3571_v46, %v4261_v41  ;;  %v1914_v49 = vpop.f32.mrb[67].mxu0  ;;  %vm2040_vm0 = vcmp.gt.f32.partialorder %v1920_v43, 0.0 }
 0x4ea   :  { %v2070_v50 = vmul.f32 0.2, %v1912_v45  ;;  %v1915_v51 = vadd.f32 %v4261_v41, %v1914_v49  ;;  %vm2038_vm1 = vcmp.gt.f32.partialorder %v1912_v45, 0.0 }
 0x4eb   :  { %vm2041_vm2 = vcmp.gt.f32.partialorder %v1923_v48, 0.0  ;;  %v2073_v52 = vmul.f32 0.2, %v1923_v48  ;;  %v2104_v54 = vsel %vm2040_vm0, %v1920_v43, %v2072_v47 }
 0x4ec   :  { %vm2039_vm3 = vcmp.gt.f32.partialorder %v1915_v51, 0.0  ;;  %v2071_v53 = vmul.f32 0.2, %v1915_v51  ;;  %v2102_v1 = vsel %vm2038_vm1, %v1912_v45, %v2070_v50 }
 0x4ed   :  { %v2105_v55 = vsel %vm2041_vm2, %v1923_v48, %v2073_v52 }
 0x4ee   :  { %v2135_v56 = vpack.c.bf16 %v2105_v55, %v2104_v54  ;;  %v3574_v57 = vpop.f32.mrb[68].mxu0  ;;  %v2103_v58 = vsel %vm2039_vm3, %v1915_v51, %v2071_v53 }
 0x4ef   :  { %v1936_v59 = vadd.f32 %v3574_v57, %v4261_v41  ;;  %v1927_v60 = vpop.f32.mrb[69].mxu0  ;;  %v2134_v39 = vpack.c.bf16 %v2103_v58, %v2102_v1 }
 0x4f0   :  { %v1928_v61 = vadd.f32 %v4261_v41, %v1927_v60  ;;  %v3575_v62 = vpop.f32.mrb[70].mxu0 }
 0x4f1   :  { %v2076_v63 = vmul.f32 0.2, %v1936_v59  ;;  %v1939_v0 = vadd.f32 %v3575_v62, %v4261_v41  ;;  %v1930_v2 = vpop.f32.mrb[71].mxu0  ;;  %3616 = vmatprep.mubr.bf16.mxu0 %v2134_v39  ;;  %vm2044_vm4 = vcmp.gt.f32.partialorder %v1936_v59, 0.0 }
 0x4f2   :  { %v2074_v3 = vmul.f32 0.2, %v1928_v61  ;;  %v1931_v4 = vadd.f32 %v4261_v41, %v1930_v2  ;;  %3617 = vmatmul.mubr.bf16.vlgmr.msra.gmra.mrb[96].mxu0 %v2135_v56  ;;  %vm2042_vm5 = vcmp.gt.f32.partialorder %v1928_v61, 0.0 }
 0x4f3   :  { %vm2045_vm6 = vcmp.gt.f32.partialorder %v1939_v0, 0.0  ;;  %v2077_v5 = vmul.f32 0.2, %v1939_v0  ;;  %v2108_v7 = vsel %vm2044_vm4, %v1936_v59, %v2076_v63 }
 0x4f4   :  { %vm2043_vm7 = vcmp.gt.f32.partialorder %v1931_v4, 0.0  ;;  %v2075_v6 = vmul.f32 0.2, %v1931_v4  ;;  %v2106_v11 = vsel %vm2042_vm5, %v1928_v61, %v2074_v3 }
 0x4f5   :  { %v2109_v9 = vsel %vm2045_vm6, %v1939_v0, %v2077_v5 }
 0x4f6   :  { %v3578_v10 = vpop.f32.mrb[72].mxu0  ;;  %v2107_v12 = vsel %vm2043_vm7, %v1931_v4, %v2075_v6  ;;  %v2137_v13 = vpack.c.bf16 %v2109_v9, %v2108_v7 }
 0x4f7   :  { %v1952_v14 = vadd.f32 %v3578_v10, %v4261_v41  ;;  %v1943_v15 = vpop.f32.mrb[73].mxu0  ;;  %v2136_v16 = vpack.c.bf16 %v2107_v12, %v2106_v11 }
 0x4f8   :  { %v1944_v17 = vadd.f32 %v4261_v41, %v1943_v15  ;;  %v3579_v18 = vpop.f32.mrb[74].mxu0 }
 0x4f9   :  { %v2080_v19 = vmul.f32 0.2, %v1952_v14  ;;  %v1955_v20 = vadd.f32 %v3579_v18, %v4261_v41  ;;  %v1946_v21 = vpop.f32.mrb[75].mxu0  ;;  %3620 = vmatprep.mubr.bf16.mxu0 %v2136_v16  ;;  %vm2048_vm8 = vcmp.gt.f32.partialorder %v1952_v14, 0.0 }
 0x4fa   :  { %v2078_v22 = vmul.f32 0.2, %v1944_v17  ;;  %v1947_v23 = vadd.f32 %v4261_v41, %v1946_v21  ;;  %3621 = vmatmul.mubr.bf16.gmra.mrb[100].mxu0 %v2137_v13  ;;  %vm2046_vm9 = vcmp.gt.f32.partialorder %v1944_v17, 0.0 }
 0x4fb   :  { %vm2049_vm10 = vcmp.gt.f32.partialorder %v1955_v20, 0.0  ;;  %v2081_v24 = vmul.f32 0.2, %v1955_v20  ;;  %v2112_v26 = vsel %vm2048_vm8, %v1952_v14, %v2080_v19 }
 0x4fc   :  { %vm2047_vm11 = vcmp.gt.f32.partialorder %v1947_v23, 0.0  ;;  %v2079_v25 = vmul.f32 0.2, %v1947_v23  ;;  %v2110_v29 = vsel %vm2046_vm9, %v1944_v17, %v2078_v22 }
 0x4fd   :  { %v2113_v27 = vsel %vm2049_vm10, %v1955_v20, %v2081_v24 }
 0x4fe   :  { %v3582_v28 = vpop.f32.mrb[76].mxu0  ;;  %v2111_v30 = vsel %vm2047_vm11, %v1947_v23, %v2079_v25  ;;  %v2139_v31 = vpack.c.bf16 %v2113_v27, %v2112_v26 }
 0x4ff   :  { %v1968_v32 = vadd.f32 %v3582_v28, %v4261_v41  ;;  %v1959_v33 = vpop.f32.mrb[77].mxu0  ;;  %v2138_v34 = vpack.c.bf16 %v2111_v30, %v2110_v29 }
 0x500   :  { %v1960_v35 = vadd.f32 %v4261_v41, %v1959_v33  ;;  %v3583_v8 = vpop.f32.mrb[78].mxu0 }
 0x501   :  { %v2084_v36 = vmul.f32 0.2, %v1968_v32  ;;  %v1971_v37 = vadd.f32 %v3583_v8, %v4261_v41  ;;  %v1962_v38 = vpop.f32.mrb[79].mxu0  ;;  %3624 = vmatprep.mubr.bf16.mxu0 %v2138_v34  ;;  %vm2052_vm12 = vcmp.gt.f32.partialorder %v1968_v32, 0.0 }
 0x502   :  { %v2082_v40 = vmul.f32 0.2, %v1960_v35  ;;  %v1963_v42 = vadd.f32 %v4261_v41, %v1962_v38  ;;  %3625 = vmatmul.mubr.bf16.gmra.mrb[104].mxu0 %v2139_v31  ;;  %vm2050_vm13 = vcmp.gt.f32.partialorder %v1960_v35, 0.0 }
 0x503   :  { %vm2053_vm14 = vcmp.gt.f32.partialorder %v1971_v37, 0.0  ;;  %v2085_v43 = vmul.f32 0.2, %v1971_v37  ;;  %v2116_v45 = vsel %vm2052_vm12, %v1968_v32, %v2084_v36 }
 0x504   :  { %vm2051_vm15 = vcmp.gt.f32.partialorder %v1963_v42, 0.0  ;;  %v2083_v44 = vmul.f32 0.2, %v1963_v42  ;;  %v2114_v48 = vsel %vm2050_vm13, %v1960_v35, %v2082_v40 }
 0x505   :  { %v2117_v46 = vsel %vm2053_vm14, %v1971_v37, %v2085_v43 }
 0x506   :  { %v3586_v47 = vpop.f32.mrb[80].mxu0  ;;  %v2115_v49 = vsel %vm2051_vm15, %v1963_v42, %v2083_v44  ;;  %v2141_v50 = vpack.c.bf16 %v2117_v46, %v2116_v45 }
 0x507   :  { %v1984_v51 = vadd.f32 %v3586_v47, %v4261_v41  ;;  %v1975_v52 = vpop.f32.mrb[81].mxu0  ;;  %v2140_v53 = vpack.c.bf16 %v2115_v49, %v2114_v48 }
 0x508   :  { %v1976_v54 = vadd.f32 %v4261_v41, %v1975_v52  ;;  %v3587_v55 = vpop.f32.mrb[82].mxu0 }
 0x509   :  { %v2088_v56 = vmul.f32 0.2, %v1984_v51  ;;  %v1987_v57 = vadd.f32 %v3587_v55, %v4261_v41  ;;  %v1978_v1 = vpop.f32.mrb[83].mxu0  ;;  %3628 = vmatprep.mubr.bf16.mxu0 %v2140_v53  ;;  %vm2056_vm0 = vcmp.gt.f32.partialorder %v1984_v51, 0.0 }
 0x50a   :  { %v2086_v58 = vmul.f32 0.2, %v1976_v54  ;;  %v1979_v59 = vadd.f32 %v4261_v41, %v1978_v1  ;;  %3629 = vmatmul.mubr.bf16.gmra.mrb[108].mxu0 %v2141_v50  ;;  %vm2054_vm1 = vcmp.gt.f32.partialorder %v1976_v54, 0.0 }
 0x50b   :  { %vm2057_vm2 = vcmp.gt.f32.partialorder %v1987_v57, 0.0  ;;  %v2089_v60 = vmul.f32 0.2, %v1987_v57  ;;  %v2120_v61 = vsel %vm2056_vm0, %v1984_v51, %v2088_v56 }
 0x50c   :  { %vm2055_vm3 = vcmp.gt.f32.partialorder %v1979_v59, 0.0  ;;  %v2087_v39 = vmul.f32 0.2, %v1979_v59  ;;  %v2118_v0 = vsel %vm2054_vm1, %v1976_v54, %v2086_v58 }
 0x50d   :  { %v2121_v62 = vsel %vm2057_vm2, %v1987_v57, %v2089_v60  ;;  %v4295_v60 = vld [vmem:[#allocation7 + $0x5] ss:$0 sm:$0xff] }
 0x50e   :  { %v3590_v63 = vpop.f32.mrb[84].mxu0  ;;  %v2119_v2 = vsel %vm2055_vm3, %v1979_v59, %v2087_v39  ;;  %v2143_v3 = vpack.c.bf16 %v2121_v62, %v2120_v61  ;;  %v3815_v59 = vld [vmem:[#allocation5 + $0x1f8] sm:$0xff]  }
 0x50f   :  { %v2000_v4 = vadd.f32 %v3590_v63, %v4261_v41  ;;  %v1991_v5 = vpop.f32.mrb[85].mxu0  ;;  %v2142_v6 = vpack.c.bf16 %v2119_v2, %v2118_v0  ;;  %3662 = vmatprep.subr.bf16.mxu1 %v3815_v59 }
 0x510   :  { %v1992_v7 = vadd.f32 %v4261_v41, %v1991_v5  ;;  %v3591_v9 = vpop.f32.mrb[86].mxu0  ;;  %3663 = vmatpush3.bf16.msra.mxu1 %v3815_v59 }
 0x511   :  { %v2092_v10 = vmul.f32 0.2, %v2000_v4  ;;  %v2003_v11 = vadd.f32 %v3591_v9, %v4261_v41  ;;  %v1994_v12 = vpop.f32.mrb[87].mxu0  ;;  %3632 = vmatprep.mubr.bf16.mxu0 %v2142_v6  ;;  %vm2060_vm4 = vcmp.gt.f32.partialorder %v2000_v4, 0.0 }
 0x512   :  { %v2090_v13 = vmul.f32 0.2, %v1992_v7  ;;  %v1995_v14 = vadd.f32 %v4261_v41, %v1994_v12  ;;  %3633 = vmatmul.mubr.bf16.gmra.mrb[112].mxu0 %v2143_v3  ;;  %vm2058_vm5 = vcmp.gt.f32.partialorder %v1992_v7, 0.0 }
 0x513   :  { %vm2061_vm6 = vcmp.gt.f32.partialorder %v2003_v11, 0.0  ;;  %v2093_v15 = vmul.f32 0.2, %v2003_v11  ;;  %v2124_v17 = vsel %vm2060_vm4, %v2000_v4, %v2092_v10 }
 0x514   :  { %vm2059_vm7 = vcmp.gt.f32.partialorder %v1995_v14, 0.0  ;;  %v2091_v16 = vmul.f32 0.2, %v1995_v14  ;;  %v2122_v20 = vsel %vm2058_vm5, %v1992_v7, %v2090_v13 }
 0x515   :  { %v2125_v18 = vsel %vm2061_vm6, %v2003_v11, %v2093_v15 }
 0x516   :  { %v3594_v19 = vpop.f32.mrb[88].mxu0  ;;  %v2123_v21 = vsel %vm2059_vm7, %v1995_v14, %v2091_v16  ;;  %v2145_v22 = vpack.c.bf16 %v2125_v18, %v2124_v17 }
 0x517   :  { %v2016_v23 = vadd.f32 %v3594_v19, %v4261_v41  ;;  %v2007_v24 = vpop.f32.mrb[89].mxu0  ;;  %v2144_v25 = vpack.c.bf16 %v2123_v21, %v2122_v20 }
 0x518   :  { %v2008_v26 = vadd.f32 %v4261_v41, %v2007_v24  ;;  %v3595_v27 = vpop.f32.mrb[90].mxu0 }
 0x519   :  { %v2096_v28 = vmul.f32 0.2, %v2016_v23  ;;  %v2019_v29 = vadd.f32 %v3595_v27, %v4261_v41  ;;  %v2010_v30 = vpop.f32.mrb[91].mxu0  ;;  %3636 = vmatprep.mubr.bf16.mxu0 %v2144_v25  ;;  %vm2064_vm8 = vcmp.gt.f32.partialorder %v2016_v23, 0.0 }
 0x51a   :  { %v2094_v31 = vmul.f32 0.2, %v2008_v26  ;;  %v2011_v32 = vadd.f32 %v4261_v41, %v2010_v30  ;;  %3637 = vmatmul.mubr.bf16.gmra.mrb[116].mxu0 %v2145_v22  ;;  %vm2062_vm9 = vcmp.gt.f32.partialorder %v2008_v26, 0.0 }
 0x51b   :  { %vm2065_vm10 = vcmp.gt.f32.partialorder %v2019_v29, 0.0  ;;  %v2097_v33 = vmul.f32 0.2, %v2019_v29  ;;  %v2128_v35 = vsel %vm2064_vm8, %v2016_v23, %v2096_v28 }
 0x51c   :  { %vm2063_vm11 = vcmp.gt.f32.partialorder %v2011_v32, 0.0  ;;  %v2095_v34 = vmul.f32 0.2, %v2011_v32  ;;  %v2126_v37 = vsel %vm2062_vm9, %v2008_v26, %v2094_v31 }
 0x51d   :  { %v2129_v8 = vsel %vm2065_vm10, %v2019_v29, %v2097_v33 }
 0x51e   :  { %v3598_v36 = vpop.f32.mrb[92].mxu0  ;;  %v2127_v38 = vsel %vm2063_vm11, %v2011_v32, %v2095_v34  ;;  %v2147_v40 = vpack.c.bf16 %v2129_v8, %v2128_v35 }
 0x51f   :  { %v2032_v42 = vadd.f32 %v3598_v36, %v4261_v41  ;;  %v2023_v43 = vpop.f32.mrb[93].mxu0  ;;  %v2146_v44 = vpack.c.bf16 %v2127_v38, %v2126_v37 }
 0x520   :  { %v2024_v45 = vadd.f32 %v4261_v41, %v2023_v43  ;;  %v3599_v46 = vpop.f32.mrb[94].mxu0 }
 0x521   :  { %v2100_v47 = vmul.f32 0.2, %v2032_v42  ;;  %v2035_v48 = vadd.f32 %v3599_v46, %v4261_v41  ;;  %v2026_v49 = vpop.f32.mrb[95].mxu0  ;;  %3640 = vmatprep.mubr.bf16.mxu0 %v2146_v44  ;;  %vm2068_vm12 = vcmp.gt.f32.partialorder %v2032_v42, 0.0 }
 0x522   :  { %v2098_v50 = vmul.f32 0.2, %v2024_v45  ;;  %v2027_v51 = vadd.f32 %v4261_v41, %v2026_v49  ;;  %3641 = vmatmul.mubr.bf16.gmra.mrb[120].mxu0 %v2147_v40  ;;  %vm2066_vm13 = vcmp.gt.f32.partialorder %v2024_v45, 0.0 }
 0x523   :  { %vm2069_vm14 = vcmp.gt.f32.partialorder %v2035_v48, 0.0  ;;  %v2101_v52 = vmul.f32 0.2, %v2035_v48  ;;  %v2132_v54 = vsel %vm2068_vm12, %v2032_v42, %v2100_v47 }
 0x524   :  { %vm2067_vm15 = vcmp.gt.f32.partialorder %v2027_v51, 0.0  ;;  %v2099_v53 = vmul.f32 0.2, %v2027_v51  ;;  %v2130_v56 = vsel %vm2066_vm13, %v2024_v45, %v2098_v50 }
 0x525   :  { %v2133_v55 = vsel %vm2069_vm14, %v2035_v48, %v2101_v52 }
 0x526   :  { %v2131_v57 = vsel %vm2067_vm15, %v2027_v51, %v2099_v53  ;;  %v2149_v1 = vpack.c.bf16 %v2133_v55, %v2132_v54 }
 0x527   :  { %v2148_v58 = vpack.c.bf16 %v2131_v57, %v2130_v56 }
 0x529   :  { %3644 = vmatprep.mubr.bf16.mxu0 %v2148_v58 }
 0x52a   :  { %3645 = vmatmul.mubr.bf16.gmra.mrb[124].mxu0 %v2149_v1 }
 0x5c5   :  { %v3618_v41 = vpop.f32.mrb[96].mxu0 }
 0x5c6   :  { %v2262_v39 = vadd.f32 %v3618_v41, %v4295_v60  ;;  %v2253_v61 = vpop.f32.mrb[97].mxu0 }
 0x5c7   :  { %v2254_v62 = vadd.f32 %v4295_v60, %v2253_v61  ;;  %v3619_v63 = vpop.f32.mrb[98].mxu0 }
 0x5c8   :  { %v2414_v0 = vmul.f32 0.2, %v2262_v39  ;;  %v2265_v2 = vadd.f32 %v3619_v63, %v4295_v60  ;;  %v2256_v3 = vpop.f32.mrb[99].mxu0  ;;  %vm2382_vm0 = vcmp.gt.f32.partialorder %v2262_v39, 0.0 }
 0x5c9   :  { %v2412_v4 = vmul.f32 0.2, %v2254_v62  ;;  %v2257_v5 = vadd.f32 %v4295_v60, %v2256_v3  ;;  %vm2380_vm1 = vcmp.gt.f32.partialorder %v2254_v62, 0.0 }
 0x5ca   :  { %vm2383_vm2 = vcmp.gt.f32.partialorder %v2265_v2, 0.0  ;;  %v2415_v6 = vmul.f32 0.2, %v2265_v2  ;;  %v2446_v9 = vsel %vm2382_vm0, %v2262_v39, %v2414_v0 }
 0x5cb   :  { %vm2381_vm3 = vcmp.gt.f32.partialorder %v2257_v5, 0.0  ;;  %v2413_v7 = vmul.f32 0.2, %v2257_v5  ;;  %v2444_v13 = vsel %vm2380_vm1, %v2254_v62, %v2412_v4 }
 0x5cc   :  { %v2447_v10 = vsel %vm2383_vm2, %v2265_v2, %v2415_v6 }
 0x5cd   :  { %v2477_v11 = vpack.c.bf16 %v2447_v10, %v2446_v9  ;;  %v3622_v12 = vpop.f32.mrb[100].mxu0  ;;  %v2445_v14 = vsel %vm2381_vm3, %v2257_v5, %v2413_v7 }
 0x5ce   :  { %v2278_v15 = vadd.f32 %v3622_v12, %v4295_v60  ;;  %v2269_v16 = vpop.f32.mrb[101].mxu0  ;;  %v2476_v17 = vpack.c.bf16 %v2445_v14, %v2444_v13 }
 0x5cf   :  { %v2270_v18 = vadd.f32 %v4295_v60, %v2269_v16  ;;  %v3623_v19 = vpop.f32.mrb[102].mxu0 }
 0x5d0   :  { %v2418_v20 = vmul.f32 0.2, %v2278_v15  ;;  %v2281_v21 = vadd.f32 %v3623_v19, %v4295_v60  ;;  %v2272_v22 = vpop.f32.mrb[103].mxu0  ;;  %3664 = vmatprep.mubr.bf16.mxu1 %v2476_v17  ;;  %vm2386_vm4 = vcmp.gt.f32.partialorder %v2278_v15, 0.0 }
 0x5d1   :  { %v2416_v23 = vmul.f32 0.2, %v2270_v18  ;;  %v2273_v24 = vadd.f32 %v4295_v60, %v2272_v22  ;;  %3665 = vmatmul.mubr.bf16.vlgmr.msra.gmra.mrb[64].mxu1 %v2477_v11  ;;  %vm2384_vm5 = vcmp.gt.f32.partialorder %v2270_v18, 0.0 }
 0x5d2   :  { %vm2387_vm6 = vcmp.gt.f32.partialorder %v2281_v21, 0.0  ;;  %v2419_v25 = vmul.f32 0.2, %v2281_v21  ;;  %v2450_v27 = vsel %vm2386_vm4, %v2278_v15, %v2418_v20 }
 0x5d3   :  { %vm2385_vm7 = vcmp.gt.f32.partialorder %v2273_v24, 0.0  ;;  %v2417_v26 = vmul.f32 0.2, %v2273_v24  ;;  %v2448_v30 = vsel %vm2384_vm5, %v2270_v18, %v2416_v23 }
 0x5d4   :  { %v2451_v28 = vsel %vm2387_vm6, %v2281_v21, %v2419_v25 }
 0x5d5   :  { %v3626_v29 = vpop.f32.mrb[104].mxu0  ;;  %v2449_v31 = vsel %vm2385_vm7, %v2273_v24, %v2417_v26  ;;  %v2479_v32 = vpack.c.bf16 %v2451_v28, %v2450_v27 }
 0x5d6   :  { %v2294_v33 = vadd.f32 %v3626_v29, %v4295_v60  ;;  %v2285_v34 = vpop.f32.mrb[105].mxu0  ;;  %v2478_v35 = vpack.c.bf16 %v2449_v31, %v2448_v30 }
 0x5d7   :  { %v2286_v8 = vadd.f32 %v4295_v60, %v2285_v34  ;;  %v3627_v36 = vpop.f32.mrb[106].mxu0 }
 0x5d8   :  { %v2422_v37 = vmul.f32 0.2, %v2294_v33  ;;  %v2297_v38 = vadd.f32 %v3627_v36, %v4295_v60  ;;  %v2288_v40 = vpop.f32.mrb[107].mxu0  ;;  %3668 = vmatprep.mubr.bf16.mxu1 %v2478_v35  ;;  %vm2390_vm8 = vcmp.gt.f32.partialorder %v2294_v33, 0.0 }
 0x5d9   :  { %v2420_v42 = vmul.f32 0.2, %v2286_v8  ;;  %v2289_v43 = vadd.f32 %v4295_v60, %v2288_v40  ;;  %3669 = vmatmul.mubr.bf16.gmra.mrb[68].mxu1 %v2479_v32  ;;  %vm2388_vm9 = vcmp.gt.f32.partialorder %v2286_v8, 0.0 }
 0x5da   :  { %vm2391_vm10 = vcmp.gt.f32.partialorder %v2297_v38, 0.0  ;;  %v2423_v44 = vmul.f32 0.2, %v2297_v38  ;;  %v2454_v46 = vsel %vm2390_vm8, %v2294_v33, %v2422_v37 }
 0x5db   :  { %vm2389_vm11 = vcmp.gt.f32.partialorder %v2289_v43, 0.0  ;;  %v2421_v45 = vmul.f32 0.2, %v2289_v43  ;;  %v2452_v49 = vsel %vm2388_vm9, %v2286_v8, %v2420_v42 }
 0x5dc   :  { %v2455_v47 = vsel %vm2391_vm10, %v2297_v38, %v2423_v44 }
 0x5dd   :  { %v3630_v48 = vpop.f32.mrb[108].mxu0  ;;  %v2453_v50 = vsel %vm2389_vm11, %v2289_v43, %v2421_v45  ;;  %v2481_v51 = vpack.c.bf16 %v2455_v47, %v2454_v46 }
 0x5de   :  { %v2310_v52 = vadd.f32 %v3630_v48, %v4295_v60  ;;  %v2301_v53 = vpop.f32.mrb[109].mxu0  ;;  %v2480_v54 = vpack.c.bf16 %v2453_v50, %v2452_v49 }
 0x5df   :  { %v2302_v55 = vadd.f32 %v4295_v60, %v2301_v53  ;;  %v3631_v56 = vpop.f32.mrb[110].mxu0 }
 0x5e0   :  { %v2426_v57 = vmul.f32 0.2, %v2310_v52  ;;  %v2313_v1 = vadd.f32 %v3631_v56, %v4295_v60  ;;  %v2304_v58 = vpop.f32.mrb[111].mxu0  ;;  %3672 = vmatprep.mubr.bf16.mxu1 %v2480_v54  ;;  %vm2394_vm12 = vcmp.gt.f32.partialorder %v2310_v52, 0.0 }
 0x5e1   :  { %v2424_v59 = vmul.f32 0.2, %v2302_v55  ;;  %v2305_v41 = vadd.f32 %v4295_v60, %v2304_v58  ;;  %3673 = vmatmul.mubr.bf16.gmra.mrb[72].mxu1 %v2481_v51  ;;  %vm2392_vm13 = vcmp.gt.f32.partialorder %v2302_v55, 0.0 }
 0x5e2   :  { %vm2395_vm14 = vcmp.gt.f32.partialorder %v2313_v1, 0.0  ;;  %v2427_v39 = vmul.f32 0.2, %v2313_v1  ;;  %v2458_v62 = vsel %vm2394_vm12, %v2310_v52, %v2426_v57 }
 0x5e3   :  { %vm2393_vm15 = vcmp.gt.f32.partialorder %v2305_v41, 0.0  ;;  %v2425_v61 = vmul.f32 0.2, %v2305_v41  ;;  %v2456_v2 = vsel %vm2392_vm13, %v2302_v55, %v2424_v59 }
 0x5e4   :  { %v2459_v63 = vsel %vm2395_vm14, %v2313_v1, %v2427_v39 }
 0x5e5   :  { %v3634_v0 = vpop.f32.mrb[112].mxu0  ;;  %v2457_v3 = vsel %vm2393_vm15, %v2305_v41, %v2425_v61  ;;  %v2483_v4 = vpack.c.bf16 %v2459_v63, %v2458_v62 }
 0x5e6   :  { %v2326_v5 = vadd.f32 %v3634_v0, %v4295_v60  ;;  %v2317_v6 = vpop.f32.mrb[113].mxu0  ;;  %v2482_v7 = vpack.c.bf16 %v2457_v3, %v2456_v2 }
 0x5e7   :  { %v2318_v9 = vadd.f32 %v4295_v60, %v2317_v6  ;;  %v3635_v10 = vpop.f32.mrb[114].mxu0 }
 0x5e8   :  { %v2430_v11 = vmul.f32 0.2, %v2326_v5  ;;  %v2329_v12 = vadd.f32 %v3635_v10, %v4295_v60  ;;  %v2320_v13 = vpop.f32.mrb[115].mxu0  ;;  %3676 = vmatprep.mubr.bf16.mxu1 %v2482_v7  ;;  %vm2398_vm0 = vcmp.gt.f32.partialorder %v2326_v5, 0.0 }
 0x5e9   :  { %v2428_v14 = vmul.f32 0.2, %v2318_v9  ;;  %v2321_v15 = vadd.f32 %v4295_v60, %v2320_v13  ;;  %3677 = vmatmul.mubr.bf16.gmra.mrb[76].mxu1 %v2483_v4  ;;  %vm2396_vm1 = vcmp.gt.f32.partialorder %v2318_v9, 0.0 }
 0x5ea   :  { %vm2399_vm2 = vcmp.gt.f32.partialorder %v2329_v12, 0.0  ;;  %v2431_v16 = vmul.f32 0.2, %v2329_v12  ;;  %v2462_v18 = vsel %vm2398_vm0, %v2326_v5, %v2430_v11 }
 0x5eb   :  { %vm2397_vm3 = vcmp.gt.f32.partialorder %v2321_v15, 0.0  ;;  %v2429_v17 = vmul.f32 0.2, %v2321_v15  ;;  %v2460_v21 = vsel %vm2396_vm1, %v2318_v9, %v2428_v14 }
 0x5ec   :  { %v2463_v19 = vsel %vm2399_vm2, %v2329_v12, %v2431_v16 }
 0x5ed   :  { %v3638_v20 = vpop.f32.mrb[116].mxu0  ;;  %v2461_v22 = vsel %vm2397_vm3, %v2321_v15, %v2429_v17  ;;  %v2485_v23 = vpack.c.bf16 %v2463_v19, %v2462_v18  ;;  %v4329_v15 = vld [vmem:[#allocation7 + $0x6] ss:$0 sm:$0xff] }
 0x5ee   :  { %v2342_v24 = vadd.f32 %v3638_v20, %v4295_v60  ;;  %v2333_v25 = vpop.f32.mrb[117].mxu0  ;;  %v2484_v26 = vpack.c.bf16 %v2461_v22, %v2460_v21 }
 0x5ef   :  { %v2334_v27 = vadd.f32 %v4295_v60, %v2333_v25  ;;  %v3639_v28 = vpop.f32.mrb[118].mxu0 }
 0x5f0   :  { %v2434_v29 = vmul.f32 0.2, %v2342_v24  ;;  %v2345_v30 = vadd.f32 %v3639_v28, %v4295_v60  ;;  %v2336_v31 = vpop.f32.mrb[119].mxu0  ;;  %3680 = vmatprep.mubr.bf16.mxu1 %v2484_v26  ;;  %vm2402_vm4 = vcmp.gt.f32.partialorder %v2342_v24, 0.0 }
 0x5f1   :  { %v2432_v32 = vmul.f32 0.2, %v2334_v27  ;;  %v2337_v33 = vadd.f32 %v4295_v60, %v2336_v31  ;;  %3681 = vmatmul.mubr.bf16.gmra.mrb[80].mxu1 %v2485_v23  ;;  %vm2400_vm5 = vcmp.gt.f32.partialorder %v2334_v27, 0.0 }
 0x5f2   :  { %vm2403_vm6 = vcmp.gt.f32.partialorder %v2345_v30, 0.0  ;;  %v2435_v34 = vmul.f32 0.2, %v2345_v30  ;;  %v2466_v8 = vsel %vm2402_vm4, %v2342_v24, %v2434_v29 }
 0x5f3   :  { %vm2401_vm7 = vcmp.gt.f32.partialorder %v2337_v33, 0.0  ;;  %v2433_v35 = vmul.f32 0.2, %v2337_v33  ;;  %v2464_v38 = vsel %vm2400_vm5, %v2334_v27, %v2432_v32 }
 0x5f4   :  { %v2467_v36 = vsel %vm2403_vm6, %v2345_v30, %v2435_v34 }
 0x5f5   :  { %v3642_v37 = vpop.f32.mrb[120].mxu0  ;;  %v2465_v40 = vsel %vm2401_vm7, %v2337_v33, %v2433_v35  ;;  %v2487_v42 = vpack.c.bf16 %v2467_v36, %v2466_v8 }
 0x5f6   :  { %v2358_v43 = vadd.f32 %v3642_v37, %v4295_v60  ;;  %v2349_v44 = vpop.f32.mrb[121].mxu0  ;;  %v2486_v45 = vpack.c.bf16 %v2465_v40, %v2464_v38  ;;  %v2722_v37 = vlaneseq }
 0x5f7   :  { %v2350_v46 = vadd.f32 %v4295_v60, %v2349_v44  ;;  %v3643_v47 = vpop.f32.mrb[122].mxu0 }
 0x5f8   :  { %v2438_v48 = vmul.f32 0.2, %v2358_v43  ;;  %v2361_v49 = vadd.f32 %v3643_v47, %v4295_v60  ;;  %v2352_v50 = vpop.f32.mrb[123].mxu0  ;;  %3684 = vmatprep.mubr.bf16.mxu1 %v2486_v45  ;;  %vm2406_vm8 = vcmp.gt.f32.partialorder %v2358_v43, 0.0 }
 0x5f9   :  { %v2436_v51 = vmul.f32 0.2, %v2350_v46  ;;  %v2353_v52 = vadd.f32 %v4295_v60, %v2352_v50  ;;  %3685 = vmatmul.mubr.bf16.gmra.mrb[84].mxu1 %v2487_v42  ;;  %vm2404_vm9 = vcmp.gt.f32.partialorder %v2350_v46, 0.0  ;;  %v2723_v50 = vand.u32 127, %v2722_v37 }
 0x5fa   :  { %vm2407_vm10 = vcmp.gt.f32.partialorder %v2361_v49, 0.0  ;;  %v2439_v53 = vmul.f32 0.2, %v2361_v49  ;;  %v2470_v55 = vsel %vm2406_vm8, %v2358_v43, %v2438_v48 }
 0x5fb   :  { %vm2405_vm11 = vcmp.gt.f32.partialorder %v2353_v52, 0.0  ;;  %v2437_v54 = vmul.f32 0.2, %v2353_v52  ;;  %v2468_v1 = vsel %vm2404_vm9, %v2350_v46, %v2436_v51  ;;  %vm2724_vm0 = vcmp.ge.s32.totalorder %v2723_v50, 1 }
 0x5fc   :  { %v2471_v56 = vsel %vm2407_vm10, %v2361_v49, %v2439_v53  ;;  %vm2725_vm1 = vcmp.lt.s32.totalorder %v2723_v50, 4 }
 0x5fd   :  { %v3646_v57 = vpop.f32.mrb[124].mxu0  ;;  %v2469_v58 = vsel %vm2405_vm11, %v2353_v52, %v2437_v54  ;;  %v2489_v59 = vpack.c.bf16 %v2471_v56, %v2470_v55  ;;  %vm4382_vm2 = vmand %vm2724_vm0, %vm2725_vm1 }
 0x5fe   :  { %v2374_v41 = vadd.f32 %v3646_v57, %v4295_v60  ;;  %v2365_v39 = vpop.f32.mrb[125].mxu0  ;;  %v2488_v61 = vpack.c.bf16 %v2469_v58, %v2468_v1 }
 0x5ff   :  { %v2366_v62 = vadd.f32 %v4295_v60, %v2365_v39  ;;  %v3647_v63 = vpop.f32.mrb[126].mxu0 }
 0x600   :  { %v2442_v0 = vmul.f32 0.2, %v2374_v41  ;;  %v2377_v2 = vadd.f32 %v3647_v63, %v4295_v60  ;;  %v2368_v3 = vpop.f32.mrb[127].mxu0  ;;  %3688 = vmatprep.mubr.bf16.mxu1 %v2488_v61  ;;  %vm2410_vm12 = vcmp.gt.f32.partialorder %v2374_v41, 0.0 }
 0x601   :  { %v2440_v4 = vmul.f32 0.2, %v2366_v62  ;;  %v2369_v5 = vadd.f32 %v4295_v60, %v2368_v3  ;;  %3689 = vmatmul.mubr.bf16.gmra.mrb[88].mxu1 %v2489_v59  ;;  %vm2408_vm13 = vcmp.gt.f32.partialorder %v2366_v62, 0.0 }
 0x602   :  { %vm2411_vm14 = vcmp.gt.f32.partialorder %v2377_v2, 0.0  ;;  %v2443_v6 = vmul.f32 0.2, %v2377_v2  ;;  %v2474_v9 = vsel %vm2410_vm12, %v2374_v41, %v2442_v0 }
 0x603   :  { %vm2409_vm15 = vcmp.gt.f32.partialorder %v2369_v5, 0.0  ;;  %v2441_v7 = vmul.f32 0.2, %v2369_v5  ;;  %v2472_v11 = vsel %vm2408_vm13, %v2366_v62, %v2440_v4 }
 0x604   :  { %v2475_v10 = vsel %vm2411_vm14, %v2377_v2, %v2443_v6 }
 0x605   :  { %v2473_v12 = vsel %vm2409_vm15, %v2369_v5, %v2441_v7  ;;  %v2491_v13 = vpack.c.bf16 %v2475_v10, %v2474_v9 }
 0x606   :  { %v2490_v14 = vpack.c.bf16 %v2473_v12, %v2472_v11 }
 0x608   :  { %3692 = vmatprep.mubr.bf16.mxu1 %v2490_v14 }
 0x609   :  { %3693 = vmatmul.mubr.bf16.gmra.mrb[92].mxu1 %v2491_v13 }
 0x6a4   :  { %v3666_v16 = vpop.f32.mrb[64].mxu1 }
 0x6a5   :  { %v4332_v17 = vadd.f32 %v3666_v16, %v4329_v15  ;;  %v2595_v60 = vpop.f32.mrb[65].mxu1 }
 0x6a6   :  { %v4335_v18 = vadd.f32 %v4329_v15, %v2595_v60  ;;  %v3667_v19 = vpop.f32.mrb[66].mxu1 }
 0x6a7   :  { %v3090_v20 = vmul.f32 -1.442695, %v4332_v17  ;;  %v4339_v21 = vadd.f32 %v3667_v19, %v4329_v15  ;;  %v2598_v22 = vpop.f32.mrb[67].mxu1 }
 0x6a8   :  { %v3088_v23 = vmul.f32 -1.442695, %v4335_v18  ;;  %v4343_v24 = vadd.f32 %v4329_v15, %v2598_v22 }
 0x6a9   :  { %3816 = vpow2.f32 %v3090_v20  ;;  %v3091_v25 = vmul.f32 -1.442695, %v4339_v21 }
 0x6aa   :  { %3818 = vpow2.f32 %v3088_v23  ;;  %v3089_v26 = vmul.f32 -1.442695, %v4343_v24 }
 0x6ab   :  { %3820 = vpow2.f32 %v3091_v25 }
 0x6ac   :  { %3822 = vpow2.f32 %v3089_v26  ;;  %v3670_v27 = vpop.f32.mrb[68].mxu1 }
 0x6ad   :  { %v4348_v28 = vadd.f32 %v3670_v27, %v4329_v15  ;;  %v2611_v29 = vpop.f32.mrb[69].mxu1 }
 0x6ae   :  { %v4351_v30 = vadd.f32 %v4329_v15, %v2611_v29  ;;  %v3671_v31 = vpop.f32.mrb[70].mxu1 }
 0x6af   :  { %v3094_v32 = vmul.f32 -1.442695, %v4348_v28  ;;  %v4355_v33 = vadd.f32 %v3671_v31, %v4329_v15  ;;  %v2614_v34 = vpop.f32.mrb[71].mxu1 }
 0x6b0   :  { %v3092_v35 = vmul.f32 -1.442695, %v4351_v30  ;;  %v4359_v8 = vadd.f32 %v4329_v15, %v2614_v34 }
 0x6b1   :  { %3824 = vpow2.f32 %v3094_v32  ;;  %v3095_v36 = vmul.f32 -1.442695, %v4355_v33 }
 0x6b2   :  { %3826 = vpow2.f32 %v3092_v35  ;;  %v3093_v38 = vmul.f32 -1.442695, %v4359_v8 }
 0x6b3   :  { %v3817_v40 = vpop.eup %3816  ;;  %3828 = vpow2.f32 %v3095_v36 }
 0x6b4   :  { %v3819_v42 = vpop.eup %3818  ;;  %v2825_v43 = vadd.f32 1.0, %v3817_v40  ;;  %3830 = vpow2.f32 %v3093_v38  ;;  %v3674_v44 = vpop.f32.mrb[72].mxu1 }
 0x6b5   :  { %v3821_v45 = vpop.eup %3820  ;;  %v2823_v46 = vadd.f32 1.0, %v3819_v42  ;;  %v4364_v47 = vadd.f32 %v3674_v44, %v4329_v15  ;;  %v2627_v48 = vpop.f32.mrb[73].mxu1 }
 0x6b6   :  { %v3823_v49 = vpop.eup %3822  ;;  %3832 = vrcp.f32 %v2825_v43  ;;  %v2826_v51 = vadd.f32 1.0, %v3821_v45  ;;  %v4367_v52 = vadd.f32 %v4329_v15, %v2627_v48  ;;  %v3675_v53 = vpop.f32.mrb[74].mxu1 }
 0x6b7   :  { %3834 = vrcp.f32 %v2823_v46  ;;  %v2824_v54 = vadd.f32 1.0, %v3823_v49  ;;  %v3098_v55 = vmul.f32 -1.442695, %v4364_v47  ;;  %v4371_v56 = vadd.f32 %v3675_v53, %v4329_v15  ;;  %v2630_v57 = vpop.f32.mrb[75].mxu1 }
 0x6b8   :  { %3836 = vrcp.f32 %v2826_v51  ;;  %v3096_v1 = vmul.f32 -1.442695, %v4367_v52  ;;  %v4375_v58 = vadd.f32 %v4329_v15, %v2630_v57 }
 0x6b9   :  { %3838 = vrcp.f32 %v2824_v54  ;;  %v3099_v59 = vmul.f32 -1.442695, %v4371_v56 }
 0x6ba   :  { %3840 = vpow2.f32 %v3098_v55  ;;  %v3097_v41 = vmul.f32 -1.442695, %v4375_v58 }
 0x6bb   :  { %v3825_v39 = vpop.eup %3824  ;;  %3842 = vpow2.f32 %v3096_v1 }
 0x6bc   :  { %v3827_v61 = vpop.eup %3826  ;;  %v2829_v62 = vadd.f32 1.0, %v3825_v39  ;;  %3844 = vpow2.f32 %v3099_v59  ;;  %v3678_v63 = vpop.f32.mrb[76].mxu1 }
 0x6bd   :  { %v3829_v0 = vpop.eup %3828  ;;  %v2827_v2 = vadd.f32 1.0, %v3827_v61  ;;  %3846 = vpow2.f32 %v3097_v41  ;;  %v4380_v3 = vadd.f32 %v3678_v63, %v4329_v15  ;;  %v2643_v4 = vpop.f32.mrb[77].mxu1 }
 0x6be   :  { %v3831_v5 = vpop.eup %3830  ;;  %3848 = vrcp.f32 %v2829_v62  ;;  %v2830_v7 = vadd.f32 1.0, %v3829_v0  ;;  %v4387_v9 = vadd.f32 %v4329_v15, %v2643_v4  ;;  %v3679_v10 = vpop.f32.mrb[78].mxu1 }
 0x6bf   :  { %3850 = vrcp.f32 %v2827_v2  ;;  %v2828_v11 = vadd.f32 1.0, %v3831_v5  ;;  %v3102_v12 = vmul.f32 -1.442695, %v4380_v3  ;;  %v4391_v13 = vadd.f32 %v3679_v10, %v4329_v15  ;;  %v2646_v14 = vpop.f32.mrb[79].mxu1 }
 0x6c0   :  { %v3833_v16 = vpop.eup %3832  ;;  %3852 = vrcp.f32 %v2830_v7  ;;  %v3100_v60 = vmul.f32 -1.442695, %v4387_v9  ;;  %v4395_v19 = vadd.f32 %v4329_v15, %v2646_v14 }
 0x6c1   :  { %v3835_v20 = vpop.eup %3834  ;;  %v2921_v22 = vsel %vm4382_vm2, %v3833_v16, %v4332_v17  ;;  %3854 = vrcp.f32 %v2828_v11  ;;  %v3103_v23 = vmul.f32 -1.442695, %v4391_v13 }
 0x6c2   :  { %v3837_v25 = vpop.eup %3836  ;;  %2953 = vst [vmem:[#allocation8 + $0x10] sm:$0xff] %v2921_v22  ;;  %v2919_v26 = vsel %vm4382_vm2, %v3835_v20, %v4335_v18  ;;  %3856 = vpow2.f32 %v3102_v12  ;;  %v3101_v27 = vmul.f32 -1.442695, %v4395_v19 }
 0x6c3   :  { %v3839_v29 = vpop.eup %3838  ;;  %2951 = vst [vmem:[#allocation8] sm:$0xff] %v2919_v26  ;;  %v2922_v31 = vsel %vm4382_vm2, %v3837_v25, %v4339_v21  ;;  %3858 = vpow2.f32 %v3100_v60 }
 0x6c4   :  { %v3841_v17 = vpop.eup %3840  ;;  %2954 = vst [vmem:[#allocation8 + $0x18] sm:$0xff] %v2922_v31  ;;  %v2920_v32 = vsel %vm4382_vm2, %v3839_v29, %v4343_v24  ;;  %3860 = vpow2.f32 %v3103_v23  ;;  %v3682_v34 = vpop.f32.mrb[80].mxu1 }
 0x6c5   :  { %v3843_v35 = vpop.eup %3842  ;;  %2952 = vst [vmem:[#allocation8 + $0x8] sm:$0xff] %v2920_v32  ;;  %v2833_v18 = vadd.f32 1.0, %v3841_v17  ;;  %3862 = vpow2.f32 %v3101_v27  ;;  %v4412_v36 = vadd.f32 %v3682_v34, %v4329_v15  ;;  %v2659_v37 = vpop.f32.mrb[81].mxu1 }
 0x6c6   :  { %v3845_v38 = vpop.eup %3844  ;;  %v2831_v40 = vadd.f32 1.0, %v3843_v35  ;;  %v4415_v21 = vadd.f32 %v4329_v15, %v2659_v37  ;;  %v3683_v42 = vpop.f32.mrb[82].mxu1 }
 0x6c7   :  { %v3847_v43 = vpop.eup %3846  ;;  %3864 = vrcp.f32 %v2833_v18  ;;  %v2834_v44 = vadd.f32 1.0, %v3845_v38  ;;  %v3106_v24 = vmul.f32 -1.442695, %v4412_v36  ;;  %v4419_v45 = vadd.f32 %v3683_v42, %v4329_v15  ;;  %v2662_v46 = vpop.f32.mrb[83].mxu1 }
 0x6c8   :  { %v3849_v48 = vpop.eup %3848  ;;  %3866 = vrcp.f32 %v2831_v40  ;;  %v2832_v49 = vadd.f32 1.0, %v3847_v43  ;;  %v3104_v50 = vmul.f32 -1.442695, %v4415_v21  ;;  %v4423_v51 = vadd.f32 %v4329_v15, %v2662_v46 }
 0x6c9   :  { %v3851_v53 = vpop.eup %3850  ;;  %v2925_v54 = vsel %vm4382_vm2, %v3849_v48, %v4348_v28  ;;  %3868 = vrcp.f32 %v2834_v44  ;;  %v3107_v55 = vmul.f32 -1.442695, %v4419_v45 }
 0x6ca   :  { %v3853_v57 = vpop.eup %3852  ;;  %2957 = vst [vmem:[#allocation8 + $0x30] sm:$0xff] %v2925_v54  ;;  %v2923_v1 = vsel %vm4382_vm2, %v3851_v53, %v4351_v30  ;;  %3870 = vrcp.f32 %v2832_v49  ;;  %v3105_v59 = vmul.f32 -1.442695, %v4423_v51 }
 0x6cb   :  { %v3855_v41 = vpop.eup %3854  ;;  %2955 = vst [vmem:[#allocation8 + $0x20] sm:$0xff] %v2923_v1  ;;  %v2926_v39 = vsel %vm4382_vm2, %v3853_v57, %v4355_v33  ;;  %3872 = vpow2.f32 %v3106_v24 }
 0x6cc   :  { %v3857_v28 = vpop.eup %3856  ;;  %2958 = vst [vmem:[#allocation8 + $0x38] sm:$0xff] %v2926_v39  ;;  %v2924_v61 = vsel %vm4382_vm2, %v3855_v41, %v4359_v8  ;;  %3874 = vpow2.f32 %v3104_v50  ;;  %v3686_v62 = vpop.f32.mrb[84].mxu1 }
 0x6cd   :  { %v3859_v63 = vpop.eup %3858  ;;  %2956 = vst [vmem:[#allocation8 + $0x28] sm:$0xff] %v2924_v61  ;;  %v2837_v30 = vadd.f32 1.0, %v3857_v28  ;;  %3876 = vpow2.f32 %v3107_v55  ;;  %v4440_v0 = vadd.f32 %v3686_v62, %v4329_v15  ;;  %v2675_v2 = vpop.f32.mrb[85].mxu1 }
 0x6ce   :  { %v3861_v4 = vpop.eup %3860  ;;  %v2835_v5 = vadd.f32 1.0, %v3859_v63  ;;  %3878 = vpow2.f32 %v3105_v59  ;;  %v4443_v33 = vadd.f32 %v4329_v15, %v2675_v2  ;;  %v3687_v7 = vpop.f32.mrb[86].mxu1 }
 0x6cf   :  { %v3863_v10 = vpop.eup %3862  ;;  %3880 = vrcp.f32 %v2837_v30  ;;  %v2838_v8 = vadd.f32 1.0, %v3861_v4  ;;  %v3110_v11 = vmul.f32 -1.442695, %v4440_v0  ;;  %v4447_v12 = vadd.f32 %v3687_v7, %v4329_v15  ;;  %v2678_v14 = vpop.f32.mrb[87].mxu1 }
 0x6d0   :  { %3882 = vrcp.f32 %v2835_v5  ;;  %v2836_v16 = vadd.f32 1.0, %v3863_v10  ;;  %v3108_v60 = vmul.f32 -1.442695, %v4443_v33  ;;  %v4451_v20 = vadd.f32 %v4329_v15, %v2678_v14 }
 0x6d1   :  { %v3865_v22 = vpop.eup %3864  ;;  %3884 = vrcp.f32 %v2838_v8  ;;  %v3111_v23 = vmul.f32 -1.442695, %v4447_v12 }
 0x6d2   :  { %v3867_v25 = vpop.eup %3866  ;;  %v2929_v26 = vsel %vm4382_vm2, %v3865_v22, %v4364_v47  ;;  %3886 = vrcp.f32 %v2836_v16  ;;  %v3109_v27 = vmul.f32 -1.442695, %v4451_v20 }
 0x6d3   :  { %v3869_v29 = vpop.eup %3868  ;;  %2961 = vst [vmem:[#allocation8 + $0x50] sm:$0xff] %v2929_v26  ;;  %v2927_v31 = vsel %vm4382_vm2, %v3867_v25, %v4367_v52  ;;  %3888 = vpow2.f32 %v3110_v11 }
 0x6d4   :  { %v3871_v17 = vpop.eup %3870  ;;  %2959 = vst [vmem:[#allocation8 + $0x40] sm:$0xff] %v2927_v31  ;;  %v2930_v32 = vsel %vm4382_vm2, %v3869_v29, %v4371_v56  ;;  %3890 = vpow2.f32 %v3108_v60  ;;  %v3690_v34 = vpop.f32.mrb[88].mxu1 }
 0x6d5   :  { %v3873_v35 = vpop.eup %3872  ;;  %2962 = vst [vmem:[#allocation8 + $0x58] sm:$0xff] %v2930_v32  ;;  %v2928_v47 = vsel %vm4382_vm2, %v3871_v17, %v4375_v58  ;;  %3892 = vpow2.f32 %v3111_v23  ;;  %v4468_v18 = vadd.f32 %v3690_v34, %v4329_v15  ;;  %v2691_v52 = vpop.f32.mrb[89].mxu1 }
 0x6d6   :  { %v3875_v37 = vpop.eup %3874  ;;  %2960 = vst [vmem:[#allocation8 + $0x48] sm:$0xff] %v2928_v47  ;;  %v2841_v38 = vadd.f32 1.0, %v3873_v35  ;;  %3894 = vpow2.f32 %v3109_v27  ;;  %v4471_v40 = vadd.f32 %v4329_v15, %v2691_v52  ;;  %v3691_v56 = vpop.f32.mrb[90].mxu1 }
 0x6d7   :  { %v3877_v42 = vpop.eup %3876  ;;  %v2839_v43 = vadd.f32 1.0, %v3875_v37  ;;  %v4474_v44 = vadd.f32 %v3691_v56, %v4329_v15  ;;  %v2694_v24 = vpop.f32.mrb[91].mxu1  ;;  %v3114_v48 = vmul.f32 -1.442695, %v4468_v18 }
 0x6d8   :  { %v3879_v58 = vpop.eup %3878  ;;  %3896 = vrcp.f32 %v2841_v38  ;;  %v2842_v46 = vadd.f32 1.0, %v3877_v42  ;;  %v4478_v49 = vadd.f32 %v4329_v15, %v2694_v24  ;;  %v3112_v54 = vmul.f32 -1.442695, %v4471_v40 }
 0x6d9   :  { %v3881_v50 = vpop.eup %3880  ;;  %3898 = vrcp.f32 %v2839_v43  ;;  %v2840_v53 = vadd.f32 1.0, %v3879_v58  ;;  %v3115_v1 = vmul.f32 -1.442695, %v4474_v44 }
 0x6da   :  { %v3883_v55 = vpop.eup %3882  ;;  %v2933_v57 = vsel %vm4382_vm2, %v3881_v50, %v4380_v3  ;;  %3900 = vrcp.f32 %v2842_v46  ;;  %v3113_v39 = vmul.f32 -1.442695, %v4478_v49 }
 0x6db   :  { %v3885_v59 = vpop.eup %3884  ;;  %2965 = vst [vmem:[#allocation8 + $0x70] sm:$0xff] %v2933_v57  ;;  %v2931_v41 = vsel %vm4382_vm2, %v3883_v55, %v4387_v9  ;;  %3902 = vrcp.f32 %v2840_v53 }
 0x6dc   :  { %v3887_v28 = vpop.eup %3886  ;;  %2963 = vst [vmem:[#allocation8 + $0x60] sm:$0xff] %v2931_v41  ;;  %v2934_v61 = vsel %vm4382_vm2, %v3885_v59, %v4391_v13  ;;  %3904 = vpow2.f32 %v3114_v48  ;;  %v3694_v3 = vpop.f32.mrb[92].mxu1 }
 0x6dd   :  { %v3889_v62 = vpop.eup %3888  ;;  %2966 = vst [vmem:[#allocation8 + $0x78] sm:$0xff] %v2934_v61  ;;  %v2932_v63 = vsel %vm4382_vm2, %v3887_v28, %v4395_v19  ;;  %3906 = vpow2.f32 %v3112_v54  ;;  %v4496_v9 = vadd.f32 %v3694_v3, %v4329_v15  ;;  %v2707_v30 = vpop.f32.mrb[93].mxu1 }
 0x6de   :  { %v3891_v2 = vpop.eup %3890  ;;  %2964 = vst [vmem:[#allocation8 + $0x68] sm:$0xff] %v2932_v63  ;;  %v2845_v4 = vadd.f32 1.0, %v3889_v62  ;;  %3908 = vpow2.f32 %v3115_v1  ;;  %v4499_v5 = vadd.f32 %v4329_v15, %v2707_v30  ;;  %v3695_v13 = vpop.f32.mrb[94].mxu1 }
 0x6df   :  { %v3893_v7 = vpop.eup %3892  ;;  %v2843_v10 = vadd.f32 1.0, %v3891_v2  ;;  %3910 = vpow2.f32 %v3113_v39  ;;  %v4502_v8 = vadd.f32 %v3695_v13, %v4329_v15  ;;  %v2710_v19 = vpop.f32.mrb[95].mxu1  ;;  %v3118_v16 = vmul.f32 -1.442695, %v4496_v9 }
 0x6e0   :  { %v3895_v11 = vpop.eup %3894  ;;  %3912 = vrcp.f32 %v2845_v4  ;;  %v2846_v14 = vadd.f32 1.0, %v3893_v7  ;;  %v4506_v60 = vadd.f32 %v4329_v15, %v2710_v19  ;;  %v3116_v23 = vmul.f32 -1.442695, %v4499_v5 }
 0x6e1   :  { %3914 = vrcp.f32 %v2843_v10  ;;  %v2844_v22 = vadd.f32 1.0, %v3895_v11  ;;  %v3119_v26 = vmul.f32 -1.442695, %v4502_v8 }
 0x6e2   :  { %v3897_v25 = vpop.eup %3896  ;;  %3916 = vrcp.f32 %v2846_v14  ;;  %v3117_v31 = vmul.f32 -1.442695, %v4506_v60 }
 0x6e3   :  { %v3899_v27 = vpop.eup %3898  ;;  %v2937_v29 = vsel %vm4382_vm2, %v3897_v25, %v4412_v36  ;;  %3918 = vrcp.f32 %v2844_v22 }
 0x6e4   :  { %v3901_v17 = vpop.eup %3900  ;;  %2969 = vst [vmem:[#allocation8 + $0x90] sm:$0xff] %v2937_v29  ;;  %v2935_v15 = vsel %vm4382_vm2, %v3899_v27, %v4415_v21  ;;  %3920 = vpow2.f32 %v3118_v16 }
 0x6e5   :  { %v3903_v32 = vpop.eup %3902  ;;  %2967 = vst [vmem:[#allocation8 + $0x80] sm:$0xff] %v2935_v15  ;;  %v2938_v34 = vsel %vm4382_vm2, %v3901_v17, %v4419_v45  ;;  %3922 = vpow2.f32 %v3116_v23 }
 0x6e6   :  { %v3905_v35 = vpop.eup %3904  ;;  %2970 = vst [vmem:[#allocation8 + $0x98] sm:$0xff] %v2938_v34  ;;  %v2936_v36 = vsel %vm4382_vm2, %v3903_v32, %v4423_v51  ;;  %3924 = vpow2.f32 %v3119_v26 }
 0x6e7   :  { %v3907_v47 = vpop.eup %3906  ;;  %2968 = vst [vmem:[#allocation8 + $0x88] sm:$0xff] %v2936_v36  ;;  %v2849_v52 = vadd.f32 1.0, %v3905_v35  ;;  %3926 = vpow2.f32 %v3117_v31 }
 0x6e8   :  { %v3909_v21 = vpop.eup %3908  ;;  %v2847_v37 = vadd.f32 1.0, %v3907_v47 }
 0x6e9   :  { %v3911_v38 = vpop.eup %3910  ;;  %3928 = vrcp.f32 %v2849_v52  ;;  %v2850_v56 = vadd.f32 1.0, %v3909_v21 }
 0x6ea   :  { %v3913_v42 = vpop.eup %3912  ;;  %3930 = vrcp.f32 %v2847_v37  ;;  %v2848_v45 = vadd.f32 1.0, %v3911_v38 }
 0x6eb   :  { %v3915_v43 = vpop.eup %3914  ;;  %v2941_v24 = vsel %vm4382_vm2, %v3913_v42, %v4440_v0  ;;  %3932 = vrcp.f32 %v2850_v56 }
 0x6ec   :  { %v3917_v51 = vpop.eup %3916  ;;  %2973 = vst [vmem:[#allocation8 + $0xb0] sm:$0xff] %v2941_v24  ;;  %v2939_v58 = vsel %vm4382_vm2, %v3915_v43, %v4443_v33  ;;  %3934 = vrcp.f32 %v2848_v45 }
 0x6ed   :  { %v3919_v46 = vpop.eup %3918  ;;  %2971 = vst [vmem:[#allocation8 + $0xa0] sm:$0xff] %v2939_v58  ;;  %v2942_v48 = vsel %vm4382_vm2, %v3917_v51, %v4447_v12 }
 0x6ee   :  { %v3921_v50 = vpop.eup %3920  ;;  %2974 = vst [vmem:[#allocation8 + $0xb8] sm:$0xff] %v2942_v48  ;;  %v2940_v0 = vsel %vm4382_vm2, %v3919_v46, %v4451_v20 }
 0x6ef   :  { %v3923_v53 = vpop.eup %3922  ;;  %2972 = vst [vmem:[#allocation8 + $0xa8] sm:$0xff] %v2940_v0  ;;  %v2853_v54 = vadd.f32 1.0, %v3921_v50 }
 0x6f0   :  { %v3925_v55 = vpop.eup %3924  ;;  %v2851_v57 = vadd.f32 1.0, %v3923_v53 }
 0x6f1   :  { %v3927_v1 = vpop.eup %3926  ;;  %3936 = vrcp.f32 %v2853_v54  ;;  %v2854_v33 = vadd.f32 1.0, %v3925_v55 }
 0x6f2   :  { %3938 = vrcp.f32 %v2851_v57  ;;  %v2852_v59 = vadd.f32 1.0, %v3927_v1 }
 0x6f3   :  { %v3929_v41 = vpop.eup %3928  ;;  %3940 = vrcp.f32 %v2854_v33 }
 0x6f4   :  { %v3931_v39 = vpop.eup %3930  ;;  %v2945_v12 = vsel %vm4382_vm2, %v3929_v41, %v4468_v18  ;;  %3942 = vrcp.f32 %v2852_v59 }
 0x6f5   :  { %v3933_v28 = vpop.eup %3932  ;;  %2977 = vst [vmem:[#allocation8 + $0xd0] sm:$0xff] %v2945_v12  ;;  %v2943_v20 = vsel %vm4382_vm2, %v3931_v39, %v4471_v40 }
 0x6f6   :  { %v3935_v61 = vpop.eup %3934  ;;  %2975 = vst [vmem:[#allocation8 + $0xc0] sm:$0xff] %v2943_v20  ;;  %v2946_v3 = vsel %vm4382_vm2, %v3933_v28, %v4474_v44 }
 0x6f7   :  { %2978 = vst [vmem:[#allocation8 + $0xd8] sm:$0xff] %v2946_v3  ;;  %v2944_v62 = vsel %vm4382_vm2, %v3935_v61, %v4478_v49 }
 0x6f8   :  { %2976 = vst [vmem:[#allocation8 + $0xc8] sm:$0xff] %v2944_v62 }
 0x6fb   :  { %v3937_v18 = vpop.eup %3936 }
 0x6fc   :  { %v3939_v63 = vpop.eup %3938  ;;  %v2949_v40 = vsel %vm4382_vm2, %v3937_v18, %v4496_v9 }
 0x6fd   :  { %v3941_v30 = vpop.eup %3940  ;;  %2981 = vst [vmem:[#allocation8 + $0xf0] sm:$0xff] %v2949_v40  ;;  %v2947_v44 = vsel %vm4382_vm2, %v3939_v63, %v4499_v5 }
 0x6fe   :  { %v3943_v2 = vpop.eup %3942  ;;  %2979 = vst [vmem:[#allocation8 + $0xe0] sm:$0xff] %v2947_v44  ;;  %v2950_v49 = vsel %vm4382_vm2, %v3941_v30, %v4502_v8 }
 0x6ff   :  { %2982 = vst [vmem:[#allocation8 + $0xf8] sm:$0xff] %v2950_v49  ;;  %v2948_v4 = vsel %vm4382_vm2, %v3943_v2, %v4506_v60 }
 0x700   :  { %2980 = vst [vmem:[#allocation8 + $0xe8] sm:$0xff] %v2948_v4 }
 0x701   :  { %4037 = shalt.err (!%p4034_p0)
}
 0x702   :  { %s4038_s25 = scalar_lea.hbm %s4574_s3, 4096 }
 0x703   :  { %p4039_p1 = scmp.ne.s32.totalorder %s4574_s3, %s4038_s25  ;;  %p4042_p2 = scmp.lt.u32.totalorder %s4038_s25, %s4574_s3 }
 0x705   :  { %p4044_p3 = pnand %p4042_p2, %p4039_p1 }
 0x707   :  { %4047 = shalt.err (!%p4044_p3)
}
 0x708   :  { %s4060_s30 = smov 128   ;;  %s4061_s4 = smov 8  }
 0x709   :  { %2994 = dma.vmem_to_hbm [thread:$0]  %s2989_s21, 4096, %s4574_s3, [#allocation4], %s4060_s30, %s4060_s30, %s4061_s4  }
 0x70a   :  { %4052 = dma.done.wait [#allocation4], 4096  }
 0x70b   :  { %4053 = vsyncadd [#allocation4], 4294963200 }
 0x70c   :  { %2998 = vsyncpa [#allocation3], 1 }
 0x70d   :  { %2999 = vsyncpa [#allocation6], 1 }
 0x70e   :  { %3000 = vsyncpa [#allocation4], 1 }

</bundles_post_ra>
